<compile_context>
chip_gen: v6e
topology: v6e:2x2x1
jax: 0.10.0
libtpu: 0.0.40
codegen_flags: <defaults>
</compile_context>

<pallas_src>
import functools

import jax
import jax.numpy as jnp
from jax.experimental import pallas as pl
from jax.experimental.pallas import tpu as pltpu


def make_conv_stats_kernel(KH, KW, pad, H_out, W_out):
    """Phase 1: conv (im2col + single MXU matmul) + per-image channel sum/sumsq."""

    def kernel(x_ref, w_ref, conv_ref, stats_ref, xp_ref):
        # x_ref:     (1, Cin, H, W)           one input image (NCHW block)
        # w_ref:     (Cout, KH*KW*Cin)        reordered conv weights
        # conv_ref:  (1, Cout, H_out*W_out)   conv output, lane-dense
        # stats_ref: (1, Cout, 2)             [:, :, 0]=sum, [:, :, 1]=sum of squares
        # xp_ref:    (Cin, H+2p, W+2p)        VMEM scratch holding the zero-padded image
        _, Cin, H, W = x_ref.shape
        HW = H_out * W_out

        # Zero-pad the halo inside the kernel (no HBM round trip for jnp.pad).
        xp_ref[...] = jnp.zeros_like(xp_ref)
        xp_ref[:, pad:pad + H, pad:pad + W] = x_ref[0]

        # im2col: rows ordered (kh, kw)-major / cin-minor to match the reordered weights.
        taps = [xp_ref[:, kh:kh + H_out, kw:kw + W_out]
                for kh in range(KH) for kw in range(KW)]
        xcol = jnp.concatenate(taps, axis=0).reshape(KH * KW * Cin, HW)

        # Single MXU matmul with K = KH*KW*Cin (instead of 9 tiny K=Cin taps).
        # On v6e/v7x the operands could be cast to bf16 (keeping f32 accumulation) if the
        # surrounding network runs bf16; kept f32 here to match the f32 PyTorch reference.
        conv = jnp.dot(w_ref[...], xcol, preferred_element_type=jnp.float32)
        conv_ref[0] = conv.astype(conv_ref.dtype)

        # Per-image partial BN statistics (reduced across the batch in the wrapper, so the
        # batch grid axis stays "parallel" for v7x's two TensorCores).
        s = jnp.sum(conv, axis=1, keepdims=True)           # (Cout, 1)
        s2 = jnp.sum(conv * conv, axis=1, keepdims=True)   # (Cout, 1)
        stats_ref[0] = jnp.concatenate([s, s2], axis=1)

    return kernel


def bn_relu_kernel(conv_ref, scale_ref, shift_ref, o_ref):
    """Phase 2: y = relu(conv * scale + shift) with BN folded into per-channel scale/shift."""
    y = conv_ref[0] * scale_ref[...] + shift_ref[...]
    o_ref[0] = jnp.maximum(y, 0.0).astype(o_ref.dtype)


@functools.partial(jax.jit, static_argnames=("padding", "eps"))
def basic_conv2d(x, w_oihw, gamma, beta, *, padding=1, eps=1e-3):
    """BasicConv2d forward: conv(bias=False) -> BatchNorm2d(train-mode stats) -> ReLU.

    x: (N, Cin, H, W) NCHW; w_oihw: (Cout, Cin, KH, KW). Returns (N, Cout, H', W') NCHW.
    """
    N, Cin, H, W = x.shape
    Cout, _, KH, KW = w_oihw.shape
    H_out = H + 2 * padding - KH + 1
    W_out = W + 2 * padding - KW + 1
    HW = H_out * W_out
    K = KH * KW * Cin

    # Reorder the (tiny) weights once: OIHW -> (Cout, KH*KW*Cin), tap-major / cin-minor.
    w2 = jnp.transpose(w_oihw, (0, 2, 3, 1)).reshape(Cout, K)

    cparams = pltpu.CompilerParams(
        dimension_semantics=("parallel",),      # batch tiles -> both v7x TensorCores
        vmem_limit_bytes=32 * 1024 * 1024,      # explicit budget, safe on v7x (64 MiB phys)
    )

    # TODO(synk): for Inception-scale shapes (H/W up to 299, Cin/Cout up to 384) add a
    # second grid axis over output-row tiles with halo handling; here one image fits VMEM.
    conv_flat, stats = pl.pallas_call(
        make_conv_stats_kernel(KH, KW, padding, H_out, W_out),
        grid_spec=pltpu.PrefetchScalarGridSpec(
            num_scalar_prefetch=0,
            grid=(N,),
            in_specs=[
                pl.BlockSpec((1, Cin, H, W), lambda n: (n, 0, 0, 0)),
                pl.BlockSpec((Cout, K), lambda n: (0, 0)),
            ],
            out_specs=(
                pl.BlockSpec((1, Cout, HW), lambda n: (n, 0, 0)),
                pl.BlockSpec((1, Cout, 2), lambda n: (n, 0, 0)),
            ),
            scratch_shapes=[
                pltpu.VMEM((Cin, H + 2 * padding, W + 2 * padding), jnp.float32),
            ],
        ),
        out_shape=(
            jax.ShapeDtypeStruct((N, Cout, HW), jnp.float32),
            jax.ShapeDtypeStruct((N, Cout, 2), jnp.float32),
        ),
        compiler_params=cparams,
    )(x, w2)

    # Fold BN into a single per-channel scale/shift (tiny per-channel math, global stats).
    count = N * HW
    mean = stats[:, :, 0].sum(axis=0) / count
    var = stats[:, :, 1].sum(axis=0) / count - mean * mean   # biased var (train-mode BN)
    scale = gamma * jax.lax.rsqrt(var + eps)
    shift = beta - mean * scale

    y_flat = pl.pallas_call(
        bn_relu_kernel,
        grid_spec=pltpu.PrefetchScalarGridSpec(
            num_scalar_prefetch=0,
            grid=(N,),
            in_specs=[
                pl.BlockSpec((1, Cout, HW), lambda n: (n, 0, 0)),
                pl.BlockSpec((Cout, 1), lambda n: (0, 0)),
                pl.BlockSpec((Cout, 1), lambda n: (0, 0)),
            ],
            out_specs=pl.BlockSpec((1, Cout, HW), lambda n: (n, 0, 0)),
        ),
        out_shape=jax.ShapeDtypeStruct((N, Cout, HW), x.dtype),
        compiler_params=cparams,
    )(conv_flat, scale.reshape(Cout, 1), shift.reshape(Cout, 1))

    # Metadata-only reshape back to NCHW (no data movement).
    return y_flat.reshape(N, Cout, H_out, W_out)


def reference(x_nchw, w_oihw, gamma, beta, *, padding=1, eps=1e-3):
    """Plain-JAX reference mirroring the PyTorch forward (train-mode BN)."""
    conv = jax.lax.conv_general_dilated(
        x_nchw, w_oihw, window_strides=(1, 1),
        padding=[(padding, padding), (padding, padding)],
        dimension_numbers=("NCHW", "OIHW", "NCHW"))
    mean = conv.mean(axis=(0, 2, 3), keepdims=True)
    var = ((conv - mean) ** 2).mean(axis=(0, 2, 3), keepdims=True)
    y = (conv - mean) * jax.lax.rsqrt(var + eps)
    y = y * gamma.reshape(1, -1, 1, 1) + beta.reshape(1, -1, 1, 1)
    return jnp.maximum(y, 0.0)


if __name__ == "__main__":
    # BasicConv2d(in_channels=4, out_channels=8, kernel_size=3, padding=1)
    N, C_IN, H, W = 2, 4, 16, 16
    C_OUT, KH, KW = 8, 3, 3

    key = jax.random.PRNGKey(0)
    kx, kw = jax.random.split(key)
    x = jax.random.normal(kx, (N, C_IN, H, W), dtype=jnp.float32)
    w = 0.1 * jax.random.normal(kw, (C_OUT, C_IN, KH, KW), dtype=jnp.float32)
    # Deterministic (non-default) BN affine params to exercise scale/shift.
    gamma = 1.0 + 0.1 * jnp.arange(C_OUT, dtype=jnp.float32)
    beta = 0.05 * jnp.arange(C_OUT, dtype=jnp.float32) - 0.1

    out = basic_conv2d(x, w, gamma, beta, padding=1)
    out = jax.block_until_ready(out)

    ref = reference(x, w, gamma, beta, padding=1)
    assert out.shape == (N, C_OUT, H, W), out.shape
    assert jnp.allclose(out, ref, atol=1e-4, rtol=1e-4), \
        float(jnp.max(jnp.abs(out - ref)))

    print("KERNEL_OK")
</pallas_src>

<mosaic_0001>
module attributes {stable_mosaic.version = 11 : i64} {
  func.func @kernel(%arg0: i32, %arg1: memref<1x4x16x16xf32, #tpu.memory_space<vmem>>, %arg2: memref<8x36xf32, #tpu.memory_space<vmem>>, %arg3: memref<1x8x256xf32, #tpu.memory_space<vmem>>, %arg4: memref<1x8x2xf32, #tpu.memory_space<vmem>>, %arg5: memref<4x18x18xf32, #tpu.memory_space<vmem>>) attributes {dimension_semantics = [#tpu.dimension_semantics<parallel>], iteration_bounds = array<i64: 2>, scalar_prefetch = 0 : i64, scratch_operands = 1 : i64, tpu.core_type = #tpu.core_type<tc>, window_params = [{transform_indices = @transform_0, window_bounds = array<i64: 1, 4, 16, 16>}, {pipeline_mode = #tpu.pipeline_mode<synchronous>, transform_indices = @transform_1, window_bounds = array<i64: 8, 36>}, {transform_indices = @transform_2, window_bounds = array<i64: 1, 8, 256>}, {transform_indices = @transform_3, window_bounds = array<i64: 1, 8, 2>}]} {
    %cst = arith.constant 0.000000e+00 : f32
    %0 = vector.broadcast %cst : f32 to vector<4x18x18xf32>
    %c0 = arith.constant 0 : index
    %c0_0 = arith.constant 0 : index
    %c0_1 = arith.constant 0 : index
    %1 = vector.load %arg5[%c0, %c0_0, %c0_1] : memref<4x18x18xf32, #tpu.memory_space<vmem>>, vector<4x18x18xf32>
    tpu.vector_store %arg5[%c0, %c0_0, %c0_1], %0 {strides = array<i32>} : memref<4x18x18xf32, #tpu.memory_space<vmem>>, vector<4x18x18xf32>,
    %c0_2 = arith.constant 0 : index
    %c0_3 = arith.constant 0 : index
    %c0_4 = arith.constant 0 : index
    %c0_5 = arith.constant 0 : index
    %2 = vector.load %arg1[%c0_2, %c0_3, %c0_4, %c0_5] : memref<1x4x16x16xf32, #tpu.memory_space<vmem>>, vector<1x4x16x16xf32>
    %3 = vector.shape_cast %2 : vector<1x4x16x16xf32> to vector<4x16x16xf32>
    %c0_6 = arith.constant 0 : index
    %c1 = arith.constant 1 : index
    %c1_7 = arith.constant 1 : index
    %4 = vector.load %arg5[%c0_6, %c1, %c1_7] : memref<4x18x18xf32, #tpu.memory_space<vmem>>, vector<4x16x16xf32>
    tpu.vector_store %arg5[%c0_6, %c1, %c1_7], %3 {strides = array<i32>} : memref<4x18x18xf32, #tpu.memory_space<vmem>>, vector<4x16x16xf32>,
    %c0_8 = arith.constant 0 : index
    %c0_9 = arith.constant 0 : index
    %c0_10 = arith.constant 0 : index
    %5 = vector.load %arg5[%c0_8, %c0_9, %c0_10] : memref<4x18x18xf32, #tpu.memory_space<vmem>>, vector<4x16x16xf32>
    %c0_11 = arith.constant 0 : index
    %c0_12 = arith.constant 0 : index
    %c1_13 = arith.constant 1 : index
    %6 = vector.load %arg5[%c0_11, %c0_12, %c1_13] : memref<4x18x18xf32, #tpu.memory_space<vmem>>, vector<4x16x16xf32>
    %c0_14 = arith.constant 0 : index
    %c0_15 = arith.constant 0 : index
    %c2 = arith.constant 2 : index
    %7 = vector.load %arg5[%c0_14, %c0_15, %c2] : memref<4x18x18xf32, #tpu.memory_space<vmem>>, vector<4x16x16xf32>
    %c0_16 = arith.constant 0 : index
    %c1_17 = arith.constant 1 : index
    %c0_18 = arith.constant 0 : index
    %8 = vector.load %arg5[%c0_16, %c1_17, %c0_18] : memref<4x18x18xf32, #tpu.memory_space<vmem>>, vector<4x16x16xf32>
    %c0_19 = arith.constant 0 : index
    %c1_20 = arith.constant 1 : index
    %c1_21 = arith.constant 1 : index
    %9 = vector.load %arg5[%c0_19, %c1_20, %c1_21] : memref<4x18x18xf32, #tpu.memory_space<vmem>>, vector<4x16x16xf32>
    %c0_22 = arith.constant 0 : index
    %c1_23 = arith.constant 1 : index
    %c2_24 = arith.constant 2 : index
    %10 = vector.load %arg5[%c0_22, %c1_23, %c2_24] : memref<4x18x18xf32, #tpu.memory_space<vmem>>, vector<4x16x16xf32>
    %c0_25 = arith.constant 0 : index
    %c2_26 = arith.constant 2 : index
    %c0_27 = arith.constant 0 : index
    %11 = vector.load %arg5[%c0_25, %c2_26, %c0_27] : memref<4x18x18xf32, #tpu.memory_space<vmem>>, vector<4x16x16xf32>
    %c0_28 = arith.constant 0 : index
    %c2_29 = arith.constant 2 : index
    %c1_30 = arith.constant 1 : index
    %12 = vector.load %arg5[%c0_28, %c2_29, %c1_30] : memref<4x18x18xf32, #tpu.memory_space<vmem>>, vector<4x16x16xf32>
    %c0_31 = arith.constant 0 : index
    %c2_32 = arith.constant 2 : index
    %c2_33 = arith.constant 2 : index
    %13 = vector.load %arg5[%c0_31, %c2_32, %c2_33] : memref<4x18x18xf32, #tpu.memory_space<vmem>>, vector<4x16x16xf32>
    %14 = tpu.concatenate %5, %6, %7, %8, %9, %10, %11, %12, %13 in 0 : vector<4x16x16xf32>, vector<4x16x16xf32>, vector<4x16x16xf32>, vector<4x16x16xf32>, vector<4x16x16xf32>, vector<4x16x16xf32>, vector<4x16x16xf32>, vector<4x16x16xf32>, vector<4x16x16xf32> -> vector<36x16x16xf32>
    %15 = vector.shape_cast %14 : vector<36x16x16xf32> to vector<36x256xf32>
    %c0_34 = arith.constant 0 : index
    %c0_35 = arith.constant 0 : index
    %16 = vector.load %arg2[%c0_34, %c0_35] : memref<8x36xf32, #tpu.memory_space<vmem>>, vector<8x36xf32>
    %cst_36 = arith.constant dense<0.000000e+00> : vector<8x256xf32>
    %17 = tpu.matmul %16, %15, %cst_36 {dimension_numbers = #tpu.dot_dimension_numbers<[1], [0], [0], [1], [0, 0, 1, 1], [], []>} : vector<8x36xf32>, vector<36x256xf32>, vector<8x256xf32> -> vector<8x256xf32>
    %c0_37 = arith.constant 0 : index
    %c0_38 = arith.constant 0 : index
    %c0_39 = arith.constant 0 : index
    %18 = vector.load %arg3[%c0_37, %c0_38, %c0_39] : memref<1x8x256xf32, #tpu.memory_space<vmem>>, vector<1x8x256xf32>
    %19 = vector.shape_cast %18 : vector<1x8x256xf32> to vector<8x256xf32>
    %20 = vector.shape_cast %17 : vector<8x256xf32> to vector<1x8x256xf32>
    tpu.vector_store %arg3[%c0_37, %c0_38, %c0_39], %20 {strides = array<i32>} : memref<1x8x256xf32, #tpu.memory_space<vmem>>, vector<1x8x256xf32>,
    %cst_40 = arith.constant dense<0.000000e+00> : vector<8xf32>
    %21 = vector.multi_reduction <add>, %17, %cst_40 [1] : vector<8x256xf32> to vector<8xf32>
    %22 = vector.shape_cast %21 : vector<8xf32> to vector<8x1xf32>
    %23 = arith.mulf %17, %17 : vector<8x256xf32>
    %cst_41 = arith.constant dense<0.000000e+00> : vector<8xf32>
    %24 = vector.multi_reduction <add>, %23, %cst_41 [1] : vector<8x256xf32> to vector<8xf32>
    %25 = vector.shape_cast %24 : vector<8xf32> to vector<8x1xf32>
    %26 = tpu.concatenate %22, %25 in 1 : vector<8x1xf32>, vector<8x1xf32> -> vector<8x2xf32>
    %c0_42 = arith.constant 0 : index
    %c0_43 = arith.constant 0 : index
    %c0_44 = arith.constant 0 : index
    %27 = vector.load %arg4[%c0_42, %c0_43, %c0_44] : memref<1x8x2xf32, #tpu.memory_space<vmem>>, vector<1x8x2xf32>
    %28 = vector.shape_cast %27 : vector<1x8x2xf32> to vector<8x2xf32>
    %29 = vector.shape_cast %26 : vector<8x2xf32> to vector<1x8x2xf32>
    tpu.vector_store %arg4[%c0_42, %c0_43, %c0_44], %29 {strides = array<i32>} : memref<1x8x2xf32, #tpu.memory_space<vmem>>, vector<1x8x2xf32>,
    return
  }
  func.func @transform_0(%arg0: i32) -> (i32, i32, i32, i32) {
    %c0_i32 = arith.constant 0 : i32
    %c0_i32_0 = arith.constant 0 : i32
    %c0_i32_1 = arith.constant 0 : i32
    %c0_i32_2 = arith.constant 0 : i32
    return %arg0, %c0_i32, %c0_i32_0, %c0_i32_1 : i32, i32, i32, i32
  }
  func.func @transform_1(%arg0: i32) -> (i32, i32) {
    %c0_i32 = arith.constant 0 : i32
    %c0_i32_0 = arith.constant 0 : i32
    %c0_i32_1 = arith.constant 0 : i32
    return %c0_i32, %c0_i32_0 : i32, i32
  }
  func.func @transform_2(%arg0: i32) -> (i32, i32, i32) {
    %c0_i32 = arith.constant 0 : i32
    %c0_i32_0 = arith.constant 0 : i32
    %c0_i32_1 = arith.constant 0 : i32
    return %arg0, %c0_i32, %c0_i32_0 : i32, i32, i32
  }
  func.func @transform_3(%arg0: i32) -> (i32, i32, i32) {
    %c0_i32 = arith.constant 0 : i32
    %c0_i32_0 = arith.constant 0 : i32
    %c0_i32_1 = arith.constant 0 : i32
    return %arg0, %c0_i32, %c0_i32_0 : i32, i32, i32
  }
}

module attributes {stable_mosaic.version = 11 : i64} {
  func.func @bn_relu_kernel(%arg0: i32, %arg1: memref<1x8x256xf32, #tpu.memory_space<vmem>>, %arg2: memref<8x1xf32, #tpu.memory_space<vmem>>, %arg3: memref<8x1xf32, #tpu.memory_space<vmem>>, %arg4: memref<1x8x256xf32, #tpu.memory_space<vmem>>) attributes {dimension_semantics = [#tpu.dimension_semantics<parallel>], iteration_bounds = array<i64: 2>, scalar_prefetch = 0 : i64, scratch_operands = 0 : i64, tpu.core_type = #tpu.core_type<tc>, window_params = [{transform_indices = @transform_0, window_bounds = array<i64: 1, 8, 256>}, {pipeline_mode = #tpu.pipeline_mode<synchronous>, transform_indices = @transform_1, window_bounds = array<i64: 8, 1>}, {pipeline_mode = #tpu.pipeline_mode<synchronous>, transform_indices = @transform_2, window_bounds = array<i64: 8, 1>}, {transform_indices = @transform_3, window_bounds = array<i64: 1, 8, 256>}]} {
    %c0 = arith.constant 0 : index
    %c0_0 = arith.constant 0 : index
    %c0_1 = arith.constant 0 : index
    %0 = vector.load %arg1[%c0, %c0_0, %c0_1] : memref<1x8x256xf32, #tpu.memory_space<vmem>>, vector<1x8x256xf32>
    %1 = vector.shape_cast %0 : vector<1x8x256xf32> to vector<8x256xf32>
    %c0_2 = arith.constant 0 : index
    %c0_3 = arith.constant 0 : index
    %2 = vector.load %arg2[%c0_2, %c0_3] : memref<8x1xf32, #tpu.memory_space<vmem>>, vector<8x1xf32>
    %3 = vector.broadcast %2 : vector<8x1xf32> to vector<8x256xf32>
    %4 = arith.mulf %1, %3 : vector<8x256xf32>
    %c0_4 = arith.constant 0 : index
    %c0_5 = arith.constant 0 : index
    %5 = vector.load %arg3[%c0_4, %c0_5] : memref<8x1xf32, #tpu.memory_space<vmem>>, vector<8x1xf32>
    %6 = vector.broadcast %5 : vector<8x1xf32> to vector<8x256xf32>
    %7 = arith.addf %4, %6 : vector<8x256xf32>
    %cst = arith.constant 0.000000e+00 : f32
    %8 = vector.broadcast %cst : f32 to vector<8x256xf32>
    %9 = arith.maximumf %7, %8 : vector<8x256xf32>
    %c0_6 = arith.constant 0 : index
    %c0_7 = arith.constant 0 : index
    %c0_8 = arith.constant 0 : index
    %10 = vector.load %arg4[%c0_6, %c0_7, %c0_8] : memref<1x8x256xf32, #tpu.memory_space<vmem>>, vector<1x8x256xf32>
    %11 = vector.shape_cast %10 : vector<1x8x256xf32> to vector<8x256xf32>
    %12 = vector.shape_cast %9 : vector<8x256xf32> to vector<1x8x256xf32>
    tpu.vector_store %arg4[%c0_6, %c0_7, %c0_8], %12 {strides = array<i32>} : memref<1x8x256xf32, #tpu.memory_space<vmem>>, vector<1x8x256xf32>,
    return
  }
  func.func @transform_0(%arg0: i32) -> (i32, i32, i32) {
    %c0_i32 = arith.constant 0 : i32
    %c0_i32_0 = arith.constant 0 : i32
    %c0_i32_1 = arith.constant 0 : i32
    return %arg0, %c0_i32, %c0_i32_0 : i32, i32, i32
  }
  func.func @transform_1(%arg0: i32) -> (i32, i32) {
    %c0_i32 = arith.constant 0 : i32
    %c0_i32_0 = arith.constant 0 : i32
    %c0_i32_1 = arith.constant 0 : i32
    return %c0_i32, %c0_i32_0 : i32, i32
  }
  func.func @transform_2(%arg0: i32) -> (i32, i32) {
    %c0_i32 = arith.constant 0 : i32
    %c0_i32_0 = arith.constant 0 : i32
    %c0_i32_1 = arith.constant 0 : i32
    return %c0_i32, %c0_i32_0 : i32, i32
  }
  func.func @transform_3(%arg0: i32) -> (i32, i32, i32) {
    %c0_i32 = arith.constant 0 : i32
    %c0_i32_0 = arith.constant 0 : i32
    %c0_i32_1 = arith.constant 0 : i32
    return %arg0, %c0_i32, %c0_i32_0 : i32, i32, i32
  }
}

</mosaic_0001>

<bundles_post_ra>
// kernel: basic_conv2d.3
= control target key start
LH: loop header
LB: loop body
LE: loop exit
PB: predicated region body
PF: predicated region fallthrough
CT: control target
= control target key end

     0   :  { %s300_s12 = smov 0   ;;  %s323_s0 = inlined_call_operand.vmem [shape: f32[2,8,256], index: 0, kind: input, shape index: {}]   ;;  %s324_s1 = inlined_call_operand.vmem [shape: f32[8,1], index: 1, kind: input, shape index: {}]   ;;  %s325_s2 = inlined_call_operand.vmem [shape: f32[8,1], index: 2, kind: input, shape index: {}]   ;;  %s326_s3 = inlined_call_operand.vmem [shape: f32[2,8,256], index: 3, kind: output, shape index: {}]  }
   0x1 LB: > { %s248_s13 = sadd.s32 4294967295, %s277_s12   ;;  %p252_p0 = scmp.ge.s32.totalorder %s277_s12, 1  ;;  %s277_s12 = sphi %s300_s12, %s13_s12  }
   0x2   : > { %p137_p1 = scmp.lt.s32.totalorder %s277_s12, 3 }
   0x4   : > { %p138_p2 = pnand %p252_p0, %p137_p1 }
   0x5   : > { %p161_p3 = scmp.lt.s32.totalorder (!%p138_p2), %s248_s13, 1 }
   0x6   : > { %141 = sbr.rel (%p138_p2) target bundleno = 146 (0x92), region = 32 }
   0xb   : > { %v173_v0 = vld [vmem:[%s324_s1] sm:$0xff]  ;;  %v279_v1 = vmov 0   ;;  %s328_s13 = smov (!%p161_p3, %s248_s13), 1 }
   0xc   : > { %270 = vset.pattern.permute.xlu0 %v279_v1  ;;  %v181_v2 = vld [vmem:[%s325_s2] sm:$0xff]  ;;  %s259_s18 = sshll.u32 %s328_s13, 4 }
   0xd   : > { %176 = vperm.xlu0 %270, %v173_v0   ;;  %s165_s21 = scalar_lea.vmem %s323_s0, %s259_s18  ;;  %s170_s24 = scalar_lea.vmem %s326_s3, %s259_s18 }
   0xe   : > { %v171_v4 = vld [vmem:[%s165_s21] sm:$0xff]  ;;  %v172_v5 = vld [vmem:[%s165_s21 + $0x8] sm:$0xff] }
  0x11   : > { %184 = vperm.xlu0 %270, %v181_v2  }
  0x88   : > { %v177_v3 = vpop.permute.xlu0 %176 }
  0x89   : > { %v179_v6 = vmul.f32 %v177_v3, %v171_v4  ;;  %v180_v7 = vmul.f32 %v177_v3, %v172_v5 }
  0x8c   : > { %v185_v8 = vpop.permute.xlu0 %184 }
  0x8d   : > { %v187_v9 = vadd.f32 %v185_v8, %v179_v6  ;;  %v188_v10 = vadd.f32 %v185_v8, %v180_v7 }
  0x8f   : > { %v189_v11 = vmax.f32 %v187_v9, 0.0  ;;  %v190_v12 = vmax.f32 %v188_v10, 0.0 }
  0x91   : > { %191 = vst [vmem:[%s170_s24] sm:$0xff] %v189_v11  ;;  %192 = vst [vmem:[%s170_s24 + $0x8] sm:$0xff] %v190_v12 }
  0x92 PF: > { %s13_s12 = sadd.s32 1, %s277_s12  }
  0x93   : > { %p10_p4 = scmp.ge.s32.totalorder %s13_s12, 4  }
  0x95   :  { %12 = sbr.rel (!%p10_p4) target bundleno = 1 (0x1), region = 62 }

// kernel: basic_conv2d.2
= control target key start
LH: loop header
LB: loop body
LE: loop exit
PB: predicated region body
PF: predicated region fallthrough
CT: control target
= control target key end

     0   :  { %9 = vsyncpa [#allocation4], 0  ;;  %s3619_s0 = inlined_call_operand.hbm [shape: f32[2,4,16,16], index: 0, kind: input, shape index: {}]   ;;  %s3620_s1 = inlined_call_operand.vmem [shape: f32[8,36], index: 1, kind: input, shape index: {}]   ;;  %s3621_s2 = inlined_call_operand.vmem [shape: f32[2,8,256], index: 2, kind: output, shape index: {0}]   ;;  %s3622_s3 = inlined_call_operand.vmem [shape: f32[2,8,2], index: 3, kind: output, shape index: {1}]  }
   0x1   :  { %11 = vsyncpa [#allocation4 + $0x1], 0  ;;  %s2427_s12 = smov 0   ;;  %s2429_s13 = smov 0  }
   0x2   :  { %s2431_s14 = smov 0   ;;  %s2433_s15 = smov 0  }
   0x3 LB: > { %s2446_s16 = sadd.s32 4294967295, %s2389_s15   ;;  %s2449_s17 = sadd.s32 1, %s2389_s15   ;;  %s2389_s15 = sphi %s2433_s15, %s3741_s15   ;;  %s2385_s14 = sphi %s2431_s14, %s3740_s14   ;;  %s2381_s13 = sphi %s2429_s13, %s3739_s13   ;;  %s2377_s12 = sphi %s2427_s12, %s3738_s12  }
   0x4   : > { %s21_s18 = ssub.s32 %s2389_s15, %s2449_s17  ;;  %s24_s19 = sadd.s32 1, %s2385_s14 }
   0x5   : > { %p22_p0 = scmp.eq.s32.totalorder %s21_s18, 0  ;;  %p31_p1 = scmp.ne.s32.totalorder %s2385_s14, %s2381_s13 }
   0x6   : > { %p32_p2 = scmp.eq.s32.totalorder %s2389_s15, 0  ;;  %p37_p3 = scmp.ne.s32.totalorder %s2381_s13, %s2377_s12 }
   0x7   : > { %s2459_s20 = scalar_select %p22_p0, %s2385_s14, %s24_s19  }
   0x8   : > { %p33_p4 = por %p32_p2, %p31_p1  ;;  %p38_p5 = scmp.eq.s32.totalorder %s2446_s16, 0 }
   0x9   : > { %p2257_p6 = scmp.lt.s32.totalorder %s2389_s15, 2  ;;  %s137_s22 = sand.u32 1, %s2385_s14  }
   0xa   : > { %p2463_p7 = por %p38_p5, %p37_p3  ;;  %s2236_s23 = sshll.u32 %s137_s22, 6 }
   0xb   : > { %s2249_s24 = sshll.u32 %s2389_s15, 10  ;;  %s141_s28 = scalar_lea.vmem [#allocation3], %s2236_s23 }
   0xc   : > { %s3658_s21 = scalar_select %p2463_p7, 1, 0 }
   0xd   : > { %s2472_s27 = scalar_lea.hbm %s3619_s0, %s2249_s24  ;;  %s148_s29 = sshll.u32 %s141_s28, 4  ;;  %s2474_s29 = int_to_ptr.vmem [resolvable:$true] %s148_s29 }
   0xe   : > { %p2476_p8 = pnand %p2257_p6, %p33_p4  ;;  %s2481_s4 = scalar_lea.sflag [#allocation4], %s137_s22 }
   0xf   : > { %s2327_s5 = scalar_lea.hbm %s2472_s27, 1024  ;;  %s2332_s8 = scalar_lea.hbm %s3619_s0, 2048 }
  0x10   : > { %p2328_p10 = scmp.ne.s32.totalorder %s2472_s27, %s2327_s5  ;;  %p2329_p11 = pneg %p2476_p8 }
  0x11   : > { %p2333_p0 = scmp.lt.s32.totalorder %s2472_s27, %s3619_s0  ;;  %p2334_p1 = scmp.lt.s32.totalorder %s2332_s8, %s2327_s5 }
  0x12   : > { %p2330_p12 = pnand %p2329_p11, %p2328_p10 }
  0x13   : > { %p2335_p2 = por %p2334_p1, %p2333_p0 }
  0x14   : > { %p2331_p13 = pneg %p2330_p12 }
  0x16   : > { %p2336_p3 = pnand %p2335_p2, %p2331_p13 }
  0x18   : > { %2339 = shalt.err (!%p2336_p3)
}
  0x19   : > { %s2340_s11 = scalar_lea.vmem %s2474_s29, 1024  ;;  %s2391_s12 = smov [#allocation3]  }
  0x1a   : > { %p2341_p4 = scmp.ne.s32.totalorder %s2474_s29, %s2340_s11  ;;  %s2345_s18 = sshll.u32 %s2391_s12, 4  ;;  %s2346_s18 = int_to_ptr.vmem [resolvable:$false] %s2345_s18 }
  0x1b   : > { %s2347_s19 = scalar_lea.vmem %s2346_s18, 2048  ;;  %p2348_p10 = scmp.lt.s32.totalorder %s2474_s29, %s2346_s18 }
  0x1c   : > { %p2343_p5 = pnand %p2341_p4, %p2329_p11  ;;  %p2349_p12 = scmp.lt.s32.totalorder %s2347_s19, %s2340_s11 }
  0x1e   : > { %p2344_p6 = pneg %p2343_p5  ;;  %p2350_p9 = por %p2349_p12, %p2348_p10 }
  0x20   : > { %p2351_p7 = pnand %p2350_p9, %p2344_p6 }
  0x22   : > { %2354 = shalt.err (!%p2351_p7)
}
  0x23   : > { %s2392_s22 = smov 128   ;;  %s2393_s23 = smov 8  }
  0x24   : > { %2256 = dma.hbm_to_vmem [thread:$0]  (!%p2476_p8), %s2472_s27, 1024, %s2474_s29, %s2481_s4, %s2392_s22, %s2392_s22, %s2393_s23  }
  0x25   : > { %p156_p11 = scmp.lt.s32.totalorder %s2389_s15, 3  ;;  %p3660_p13 = scmp.ge.s32.totalorder %s2389_s15, 1 }
  0x27   : > { %p157_p0 = pnand %p3660_p13, %p156_p11 }
  0x29   : > { %160 = sbr.rel (%p157_p0) target bundleno = 924 (0x39c), region = 28 }
  0x2e   : > { %s162_s24 = sand.u32 1, %s2381_s13   ;;  %p3661_p7 = scmp.ne.s32.totalorder %s3658_s21, 0 }
  0x2f   : > { %s2240_s25 = sshll.u32 %s162_s24, 6  ;;  %s163_s26 = scalar_lea.sflag [#allocation4], %s162_s24 }
  0x30   : > { %s2506_s28 = scalar_lea.vmem [#allocation3], %s2240_s25 }
  0x31   : > { %2372 = dma.done.wait (%p3661_p7), %s163_s26, 1024  }
  0x32   : > { %2374 = vsyncadd (%p3661_p7), %s163_s26, 4294966272  ;;  %vm202_vm0 = vcmask 146432   ;;  %vm205_vm1 = vcmask 140288   ;;  %v3626_v0 = vmov 0.0   ;;  %v221_v1 = vld [vmem:[%s2506_s28 + $0x28] sm:$0xff]  ;;  %s2395_s15 = smov 1   ;;  %v462_v13 = vlaneseq }
  0x33   : > { %211 = vst.msk [vmem:[#allocation2 + $0x38] sm:$0xff] %vm202_vm0, %v3626_v0  ;;  %203 = vst.msk [vmem:[#allocation2] sm:$0xff] %vm202_vm0, %v3626_v0  ;;  %2114 = vmatprep.mubr.f32.mxu0 %v3626_v0  ;;  %v217_v2 = vld [vmem:[%s2506_s28 + $0x8] sm:$0xff]  ;;  %242 = vrot.lane.b32.xlu1 %v221_v1, %s2395_s15  ;;  %v223_v3 = vld [vmem:[%s2506_s28 + $0x38] sm:$0xff]  ;;  %vm256_vm2 = vcmask 138248   ;;  %s2397_s21 = smov 126  }
  0x34   : > { %212 = vst.msk [vmem:[#allocation2 + $0x40] sm:$0x3] %vm205_vm1, %v3626_v0  ;;  %206 = vst.msk [vmem:[#allocation2 + $0x10] sm:$0x3] %vm205_vm1, %v3626_v0  ;;  %234 = vrot.lane.b32.xlu0 %v217_v2, %s2395_s15  ;;  %v219_v4 = vld [vmem:[%s2506_s28 + $0x18] sm:$0xff]  ;;  %v218_v5 = vld [vmem:[%s2506_s28 + $0x10] sm:$0xff] }
  0x35   : > { %204 = vst.msk [vmem:[#allocation2 + $0x8] sm:$0xff] %vm202_vm0, %v3626_v0  ;;  %207 = vst.msk [vmem:[#allocation2 + $0x18] sm:$0xff] %vm202_vm0, %v3626_v0  ;;  %v216_v6 = vld [vmem:[%s2506_s28] sm:$0xff]  ;;  %v222_v7 = vld [vmem:[%s2506_s28 + $0x30] sm:$0xff]  ;;  %v2396_v11 = vmov 1983009808  }
  0x36   : > { %208 = vst.msk [vmem:[#allocation2 + $0x20] sm:$0xff] %vm202_vm0, %v3626_v0  ;;  %210 = vst.msk [vmem:[#allocation2 + $0x30] sm:$0xff] %vm202_vm0, %v3626_v0  ;;  %v220_v8 = vld [vmem:[%s2506_s28 + $0x20] sm:$0xff]  ;;  %v460_v12 = vunpack.c.l.s4 %v2396_v11  ;;  %v2537_v17 = vshrl.u32 %v462_v13, 7  ;;  %s2398_s27 = smov 127   ;;  %s2400_s29 = smov 32  }
  0x37   : > { %209 = vst.msk [vmem:[#allocation2 + $0x28] sm:$0x3] %vm205_vm1, %v3626_v0  ;;  %215 = vst.msk [vmem:[#allocation2 + $0x58] sm:$0x3] %vm205_vm1, %v3626_v0  ;;  %246 = vrot.lane.b32.xlu1 %v223_v3, %s2395_s15  ;;  %s2401_s30 = smov 96   ;;  %s2402_s4 = smov 16  }
  0x38   : > { %213 = vst.msk [vmem:[#allocation2 + $0x48] sm:$0xff] %vm202_vm0, %v3626_v0  ;;  %214 = vst.msk [vmem:[#allocation2 + $0x50] sm:$0xff] %vm202_vm0, %v3626_v0  ;;  %238 = vrot.lane.b32.xlu0 %v219_v4, %s2395_s15  ;;  %v461_v16 = vunpack.c.0.s8 %v460_v12  ;;  %s2403_s5 = smov 64   ;;  %s2404_s6 = smov 48   ;;  %vm1961_vm3 = vcmask 130048   ;;  %vm1967_vm4 = vcmask 261120  }
  0x39   : > { %s2405_s7 = smov 80   ;;  %s2406_s8 = smov 112   ;;  %vm1973_vm5 = vcmask 392192   ;;  %vm1979_vm6 = vcmask 523264   ;;  %vm1985_vm7 = vcmask 654336   ;;  %vm1991_vm8 = vcmask 785408  }
  0x3a   : > { %v2560_v28 = vsub.s32 %v461_v16, %v2537_v17  ;;  %vm1997_vm9 = vcmask 916480   ;;  %vm2043_vm10 = vcmask 1043456   ;;  %vm2039_vm11 = vcmask 293888   ;;  %p193_p8 = scmp.lt.s32.totalorder %s2446_s16, 1 }
  0x3b   : > { %236 = vrot.lane.b32.xlu1 %v218_v5, %s2395_s15  ;;  %vm2131_vm12 = vcmask 7168   ;;  %vm2133_vm13 = vcmask 15360  }
  0x3c   : > { %232 = vrot.lane.b32.xlu0 %v216_v6, %s2395_s15  ;;  %s3743_s16 = smov (!%p193_p8, %s2446_s16), 1 }
  0x3d   : > { %s2250_s11 = sshll.u32 %s3743_s16, 4  ;;  %s2243_s22 = sshll.u32 %s3743_s16, 3 }
  0x3e   : > { %s197_s19 = scalar_lea.vmem %s3621_s2, %s2250_s11  ;;  %s201_s25 = scalar_lea.vmem %s3622_s3, %s2243_s22 }
  0x3f   : > { %244 = vrot.lane.b32.xlu1 %v222_v7, %s2395_s15 }
  0x40   : > { %240 = vrot.lane.b32.xlu0 %v220_v8, %s2395_s15 }
  0xa5   : > { %v243_v9 = vpop.permute.xlu1 %242 }
  0xa6   : > { %v235_v10 = vpop.permute.xlu0 %234  ;;  %262 = vst.msk [vmem:[#allocation2 + $0x39] sm:$0xff] %vm256_vm2, %v243_v9 }
  0xa7   : > { %258 = vst.msk [vmem:[#allocation2 + $0x9] sm:$0xff] %vm256_vm2, %v235_v10 }
  0xa9   : > { %v247_v14 = vpop.permute.xlu1 %246 }
  0xaa   : > { %v239_v15 = vpop.permute.xlu0 %238  ;;  %264 = vst.msk [vmem:[#allocation2 + $0x51] sm:$0xff] %vm256_vm2, %v247_v14 }
  0xab   : > { %260 = vst.msk [vmem:[#allocation2 + $0x21] sm:$0xff] %vm256_vm2, %v239_v15 }
  0xad   : > { %v237_v18 = vpop.permute.xlu1 %236  ;;  %v2541_v21 = vld [vmem:[#allocation2 + $0x3a] sm:$0xff] }
  0xae   : > { %v233_v19 = vpop.permute.xlu0 %232  ;;  %v2539_v20 = vld [vmem:[#allocation2 + $0xa] sm:$0xff]  ;;  %259 = vst.msk [vmem:[#allocation2 + $0x19] sm:$0xff] %vm256_vm2, %v237_v18  ;;  %v2553_v25 = vld [vmem:[#allocation2 + $0x39] sm:$0xff] }
  0xaf   : > { %v2543_v22 = vld [vmem:[#allocation2 + $0x9] sm:$0xff]  ;;  %257 = vst.msk [vmem:[#allocation2 + $0x1] sm:$0xff] %vm256_vm2, %v233_v19  ;;  %435 = vrot.lane.b32.xlu0 %v2539_v20, %s2397_s21  ;;  %v1477_v23 = vcombine.low %v2539_v20, %v2541_v21  ;;  %v1478_v24 = vcombine.high %v2539_v20, %v2541_v21 }
  0xb0   : > { %v1237_v26 = vcombine.low %v2543_v22, %v2553_v25  ;;  %v1238_v27 = vcombine.high %v2543_v22, %v2553_v25 }
  0xb1   : > { %v245_v29 = vpop.permute.xlu1 %244  ;;  %v2562_v32 = vld [vmem:[#allocation2 + $0x52] sm:$0xff]  ;;  %v2580_v39 = vrot.slane %v1477_v23, %v2560_v28  ;;  %v2583_v40 = vrot.slane %v1478_v24, %v2560_v28 }
  0xb2   : > { %v241_v30 = vpop.permute.xlu0 %240  ;;  %v284_v31 = vld [vmem:[#allocation2 + $0x22] sm:$0xff]  ;;  %263 = vst.msk [vmem:[#allocation2 + $0x49] sm:$0xff] %vm256_vm2, %v245_v29  ;;  %v2573_v36 = vld [vmem:[#allocation2 + $0x51] sm:$0xff]  ;;  %v2592_v44 = vrot.slane %v1237_v26, %v2560_v28  ;;  %v2595_v45 = vrot.slane %v1238_v27, %v2560_v28 }
  0xb3   : > { %v2564_v33 = vld [vmem:[#allocation2 + $0x21] sm:$0xff]  ;;  %261 = vst.msk [vmem:[#allocation2 + $0x31] sm:$0xff] %vm256_vm2, %v241_v30  ;;  %439 = vrot.lane.b32.xlu1 %v284_v31, %s2397_s21  ;;  %443 = vrot.lane.b32.xlu0 %v2541_v21, %s2397_s21  ;;  %v1493_v34 = vcombine.low %v284_v31, %v2562_v32  ;;  %v1494_v35 = vcombine.high %v284_v31, %v2562_v32 }
  0xb4   : > { %v1253_v37 = vcombine.low %v2564_v33, %v2573_v36  ;;  %v1254_v38 = vcombine.high %v2564_v33, %v2573_v36  ;;  %3662 = vst [vmem:[#allocation6_spill] sm:$0xff] %v2595_v45 }
  0xb5   : > { %v2586_v41 = vrot.slane %v1493_v34, %v2560_v28  ;;  %v2589_v42 = vrot.slane %v1494_v35, %v2560_v28  ;;  %v283_v55 = vld [vmem:[#allocation2 + $0x1a] sm:$0xff] }
  0xb6   : > { %v281_v43 = vld [vmem:[#allocation2 + $0x2] sm:$0xff]  ;;  %v2598_v46 = vrot.slane %v1253_v37, %v2560_v28  ;;  %v2601_v47 = vrot.slane %v1254_v38, %v2560_v28  ;;  %v275_v57 = vld [vmem:[#allocation2 + $0x19] sm:$0xff]  ;;  %v2399_v37 = vmov 1934713408  }
  0xb7   : > { %447 = vrot.lane.b32.xlu1 %v2562_v32, %s2397_s21  ;;  %433 = vrot.lane.b32.xlu0 %v281_v43, %s2397_s21  ;;  %v1541_v48 = vcombine.low %v2580_v39, %v2586_v41  ;;  %v1542_v49 = vcombine.high %v2580_v39, %v2586_v41  ;;  %v273_v56 = vld [vmem:[#allocation2 + $0x1] sm:$0xff]  ;;  %v524_v38 = vunpack.c.l.s4 %v2399_v37 }
  0xb8   : > { %3663 = vst [vmem:[#allocation7_spill] sm:$0xff] %v2601_v47  ;;  %v2714_v30 = vld [vmem:[#allocation2] sm:$0xff] }
  0xb9   : > { %v287_v60 = vld [vmem:[#allocation2 + $0x4a] sm:$0xff]  ;;  %3671 = vst [vmem:[#allocation15_spill] sm:$0xff] %v2714_v30 }
  0xba   : > { %v285_v59 = vld [vmem:[#allocation2 + $0x32] sm:$0xff]  ;;  %v881_v1 = vcombine.low %v283_v55, %v287_v60  ;;  %v279_v2 = vld [vmem:[#allocation2 + $0x49] sm:$0xff]  ;;  %v882_v3 = vcombine.high %v283_v55, %v287_v60 }
  0xbb   : > { %v277_v61 = vld [vmem:[#allocation2 + $0x31] sm:$0xff]  ;;  %437 = vrot.lane.b32.xlu1 %v283_v55, %s2397_s21  ;;  %441 = vrot.lane.b32.xlu0 %v285_v59, %s2397_s21  ;;  %v865_v62 = vcombine.low %v281_v43, %v285_v59  ;;  %v866_v63 = vcombine.high %v281_v43, %v285_v59  ;;  %v641_v6 = vcombine.low %v275_v57, %v279_v2 }
  0xbc   : > { %v625_v4 = vcombine.low %v273_v56, %v277_v61  ;;  %v626_v5 = vcombine.high %v273_v56, %v277_v61  ;;  %v642_v7 = vcombine.high %v275_v57, %v279_v2  ;;  %v2629_v9 = vrot.slane %v881_v1, %v2560_v28  ;;  %v2706_v27 = vld [vmem:[#allocation2 + $0x38] sm:$0xff]  ;;  %v2712_v29 = vld [vmem:[#allocation2 + $0x50] sm:$0xff] }
  0xbd   : > { %v2625_v8 = vrot.slane %v865_v62, %v2560_v28  ;;  %v2634_v10 = vrot.slane %v866_v63, %v2560_v28  ;;  %v2637_v11 = vrot.slane %v882_v3, %v2560_v28  ;;  %v2643_v13 = vrot.slane %v641_v6, %v2560_v28  ;;  %3670 = vst [vmem:[#allocation14_spill] sm:$0xff] %v2712_v29 }
  0xbe   : > { %v2640_v12 = vrot.slane %v625_v4, %v2560_v28  ;;  %v2649_v14 = vrot.slane %v626_v5, %v2560_v28  ;;  %v2652_v15 = vrot.slane %v642_v7, %v2560_v28 }
  0xbf   : > { %445 = vrot.lane.b32.xlu1 %v287_v60, %s2397_s21  ;;  %411 = vrot.lane.b32.xlu0 %v2539_v20, %s2398_s27  ;;  %3664 = vst [vmem:[#allocation8_spill] sm:$0xff] %v2634_v10  ;;  %3665 = vst [vmem:[#allocation9_spill] sm:$0xff] %v2637_v11  ;;  %v929_v16 = vcombine.low %v2625_v8, %v2629_v9 }
  0xc0   : > { %3666 = vst [vmem:[#allocation10_spill] sm:$0xff] %v2649_v14  ;;  %3667 = vst [vmem:[#allocation11_spill] sm:$0xff] %v2652_v15 }
  0xc3   : > { %415 = vrot.lane.b32.xlu1 %v284_v31, %s2398_s27  ;;  %419 = vrot.lane.b32.xlu0 %v2541_v21, %s2398_s27  ;;  %v2720_v31 = vld [vmem:[#allocation2 + $0x18] sm:$0xff] }
  0xc7   : > { %423 = vrot.lane.b32.xlu1 %v2562_v32, %s2398_s27  ;;  %409 = vrot.lane.b32.xlu0 %v281_v43, %s2398_s27  ;;  %v2722_v32 = vld [vmem:[#allocation2 + $0x30] sm:$0xff] }
  0xc8   : > { %3672 = vst [vmem:[#allocation16_spill] sm:$0xff] %v2722_v32 }
  0xcb   : > { %413 = vrot.lane.b32.xlu1 %v283_v55, %s2398_s27  ;;  %417 = vrot.lane.b32.xlu0 %v285_v59, %s2398_s27 }
  0xcf   : > { %421 = vrot.lane.b32.xlu1 %v287_v60, %s2398_s27  ;;  %355 = vrot.lane.b32.xlu0 %v2543_v22, %s2398_s27 }
  0xd3   : > { %359 = vrot.lane.b32.xlu1 %v2564_v33, %s2398_s27  ;;  %363 = vrot.lane.b32.xlu0 %v2553_v25, %s2398_s27 }
  0xd7   : > { %367 = vrot.lane.b32.xlu1 %v2573_v36, %s2398_s27  ;;  %379 = vrot.lane.b32.xlu0 %v2543_v22, %s2397_s21  ;;  %v2699_v22 = vld [vmem:[#allocation2 + $0x8] sm:$0xff] }
  0xd8   : > { %3668 = vst [vmem:[#allocation12_spill] sm:$0xff] %v2699_v22 }
  0xdb   : > { %383 = vrot.lane.b32.xlu1 %v2564_v33, %s2397_s21  ;;  %387 = vrot.lane.b32.xlu0 %v2553_v25, %s2397_s21  ;;  %v2704_v25 = vld [vmem:[#allocation2 + $0x20] sm:$0xff]  ;;  %v2728_v33 = vld [vmem:[#allocation2 + $0x48] sm:$0xff] }
  0xdc   : > { %3669 = vst [vmem:[#allocation13_spill] sm:$0xff] %v2704_v25 }
  0xdf   : > { %391 = vrot.lane.b32.xlu1 %v2573_v36, %s2397_s21  ;;  %353 = vrot.lane.b32.xlu0 %v273_v56, %s2398_s27 }
  0xe3   : > { %357 = vrot.lane.b32.xlu1 %v275_v57, %s2398_s27  ;;  %361 = vrot.lane.b32.xlu0 %v277_v61, %s2398_s27 }
  0xe7   : > { %365 = vrot.lane.b32.xlu1 %v279_v2, %s2398_s27  ;;  %377 = vrot.lane.b32.xlu0 %v273_v56, %s2397_s21 }
  0xeb   : > { %381 = vrot.lane.b32.xlu1 %v275_v57, %s2397_s21  ;;  %385 = vrot.lane.b32.xlu0 %v277_v61, %s2397_s21  ;;  %v525_v61 = vunpack.c.0.s8 %v524_v38 }
  0xed   : > { %v2753_v5 = vsub.s32 %v525_v61, %v2537_v17 }
  0xef   : > { %389 = vrot.lane.b32.xlu1 %v279_v2, %s2397_s21  ;;  %323 = vrot.lane.b32.xlu0 %v2699_v22, %s2397_s21 }
  0xf3   : > { %327 = vrot.lane.b32.xlu1 %v2704_v25, %s2397_s21  ;;  %331 = vrot.lane.b32.xlu0 %v2706_v27, %s2397_s21 }
  0xf7   : > { %335 = vrot.lane.b32.xlu1 %v2712_v29, %s2397_s21  ;;  %321 = vrot.lane.b32.xlu0 %v2714_v30, %s2397_s21 }
  0xfb   : > { %325 = vrot.lane.b32.xlu1 %v2720_v31, %s2397_s21  ;;  %329 = vrot.lane.b32.xlu0 %v2722_v32, %s2397_s21 }
  0xff   : > { %333 = vrot.lane.b32.xlu1 %v2728_v33, %s2397_s21  ;;  %299 = vrot.lane.b32.xlu0 %v2699_v22, %s2398_s27 }
 0x103   : > { %303 = vrot.lane.b32.xlu1 %v2704_v25, %s2398_s27  ;;  %307 = vrot.lane.b32.xlu0 %v2706_v27, %s2398_s27 }
 0x107   : > { %311 = vrot.lane.b32.xlu1 %v2712_v29, %s2398_s27  ;;  %297 = vrot.lane.b32.xlu0 %v2714_v30, %s2398_s27 }
 0x10b   : > { %301 = vrot.lane.b32.xlu1 %v2720_v31, %s2398_s27  ;;  %305 = vrot.lane.b32.xlu0 %v2722_v32, %s2398_s27 }
 0x10f   : > { %309 = vrot.lane.b32.xlu1 %v2728_v33, %s2398_s27 }
 0x121   : > { %v436_v34 = vpop.permute.xlu0 %435 }
 0x125   : > { %v440_v35 = vpop.permute.xlu1 %439  ;;  %v444_v36 = vpop.permute.xlu0 %443 }
 0x126   : > { %v1613_v43 = vcombine.low %v436_v34, %v444_v36  ;;  %v1614_v57 = vcombine.high %v436_v34, %v444_v36 }
 0x128   : > { %v1621_v62 = vrot.slane %v1613_v43, %v2560_v28  ;;  %v1628_v4 = vrot.slane %v1614_v57, %v2560_v28 }
 0x129   : > { %v448_v55 = vpop.permute.xlu1 %447  ;;  %v434_v56 = vpop.permute.xlu0 %433 }
 0x12a   : > { %v1629_v59 = vcombine.low %v440_v35, %v448_v55  ;;  %v1630_v60 = vcombine.high %v440_v35, %v448_v55 }
 0x12c   : > { %v1637_v63 = vrot.slane %v1629_v59, %v2560_v28  ;;  %v1644_v1 = vrot.slane %v1630_v60, %v2560_v28 }
 0x12d   : > { %v438_v2 = vpop.permute.xlu1 %437  ;;  %v442_v3 = vpop.permute.xlu0 %441 }
 0x12e   : > { %v1646_v6 = vcombine.high %v1621_v62, %v1637_v63  ;;  %v1001_v7 = vcombine.low %v434_v56, %v442_v3  ;;  %v1645_v37 = vcombine.low %v1621_v62, %v1637_v63  ;;  %v1662_v35 = vcombine.high %v1628_v4, %v1644_v1 }
 0x12f   : > { %v1002_v63 = vcombine.high %v434_v56, %v442_v3 }
 0x130   : > { %v2756_v34 = vrot.slane %v1646_v6, %v2753_v5  ;;  %v1009_v55 = vrot.slane %v1001_v7, %v2560_v28  ;;  %v2765_v59 = vrot.slane %v1662_v35, %v2753_v5  ;;  %v2768_v60 = vrot.slane %v1645_v37, %v2753_v5 }
 0x131   : > { %v446_v36 = vpop.permute.xlu1 %445  ;;  %v2758_v38 = vpop.permute.xlu0 %411  ;;  %v1661_v7 = vcombine.low %v1628_v4, %v1644_v1  ;;  %v1016_v3 = vrot.slane %v1002_v63, %v2560_v28 }
 0x132   : > { %v1017_v43 = vcombine.low %v438_v2, %v446_v36  ;;  %1854 = vrot.lane.b32.xlu0 %v2756_v34, %s2400_s29  ;;  %v1018_v57 = vcombine.high %v438_v2, %v446_v36  ;;  %3673 = vst [vmem:[#allocation17_spill] sm:$0xff] %v2768_v60  ;;  %v1677_v37 = vcombine.high %v2768_v60, %v3626_v0 }
 0x134   : > { %v1025_v17 = vrot.slane %v1017_v43, %v2560_v28  ;;  %v1032_v2 = vrot.slane %v1018_v57, %v2560_v28 }
 0x135   : > { %v2770_v61 = vpop.permute.xlu1 %415  ;;  %v2772_v62 = vpop.permute.xlu0 %419 }
 0x136   : > { %1934 = vrot.lane.b32.xlu0 %v2765_v59, %s2401_s30  ;;  %v1034_v6 = vcombine.high %v1009_v55, %v1025_v17  ;;  %v1509_v35 = vcombine.low %v2758_v38, %v2772_v62  ;;  %v1049_v26 = vcombine.low %v1016_v3, %v1032_v2  ;;  %v1033_v54 = vcombine.low %v1009_v55, %v1025_v17 }
 0x137   : > { %v1050_v23 = vcombine.high %v1016_v3, %v1032_v2 }
 0x138   : > { %v2780_v36 = vrot.slane %v1034_v6, %v2753_v5  ;;  %v1517_v4 = vrot.slane %v1509_v35, %v2560_v28  ;;  %v2797_v6 = vrot.slane %v1661_v7, %v2753_v5  ;;  %v2809_v35 = vrot.slane %v1541_v48, %v2753_v5 }
 0x139   : > { %v2784_v43 = vpop.permute.xlu1 %423  ;;  %v2786_v56 = vpop.permute.xlu0 %409  ;;  %v2836_v2 = vrot.slane %v1050_v23, %v2753_v5  ;;  %v2852_v23 = vrot.slane %v929_v16, %v2753_v5  ;;  %v1556_v16 = vrot.slane %v1542_v49, %v2753_v5  ;;  %v3679_v49 = vcombine.high %v2625_v8, %v2629_v9 }
 0x13a   : > { %v1525_v1 = vcombine.low %v2770_v61, %v2784_v43  ;;  %1714 = vrot.lane.b32.xlu1 %v2780_v36, %s2400_s29  ;;  %1834 = vrot.lane.b32.xlu0 %v1677_v37, %s2402_s4  ;;  %3674 = vst [vmem:[#allocation18_spill] sm:$0xff] %v2809_v35  ;;  %v2814_v37 = vrot.slane %v1049_v26, %v2753_v5 }
 0x13b   : > { %v2830_v26 = vrot.slane %v1033_v54, %v2753_v5  ;;  %3677 = vst [vmem:[#allocation21_spill] sm:$0xff] %v2852_v23  ;;  %v1066_v41 = vcombine.high %v2780_v36, %v3626_v0 }
 0x13c   : > { %v1533_v57 = vrot.slane %v1525_v1, %v2560_v28 }
 0x13d   : > { %v2799_v58 = vpop.permute.xlu1 %413  ;;  %v2801_v63 = vpop.permute.xlu0 %417  ;;  %3676 = vst [vmem:[#allocation20_spill] sm:$0xff] %v2830_v26  ;;  %v1065_v54 = vcombine.high %v2830_v26, %v3626_v0 }
 0x13e   : > { %v1573_v24 = vcombine.low %v1517_v4, %v1533_v57  ;;  %1894 = vrot.lane.b32.xlu1 %v2797_v6, %s2403_s5  ;;  %v897_v7 = vcombine.low %v2786_v56, %v2801_v63  ;;  %v1574_v51 = vcombine.high %v1517_v4, %v1533_v57 }
 0x140   : > { %v2817_v1 = vrot.slane %v1573_v24, %v2753_v5  ;;  %v905_v24 = vrot.slane %v897_v7, %v2560_v28  ;;  %v1588_v3 = vrot.slane %v1574_v51, %v2753_v5 }
 0x141   : > { %v2819_v21 = vpop.permute.xlu1 %421  ;;  %v2821_v53 = vpop.permute.xlu0 %355 }
 0x142   : > { %3675 = vst [vmem:[#allocation19_spill] sm:$0xff] %v2817_v1  ;;  %v913_v55 = vcombine.low %v2799_v58, %v2819_v21  ;;  %1754 = vrot.lane.b32.xlu1 %v2814_v37, %s2403_s5  ;;  %v1606_v48 = vcombine.high %v2809_v35, %v2817_v1  ;;  %v1608_v8 = vcombine.high %v1556_v16, %v1588_v3 }
 0x144   : > { %v921_v17 = vrot.slane %v913_v55, %v2560_v28  ;;  %1832 = vrot.lane.b32.xlu0 %v1606_v48, %s2402_s4 }
 0x145   : > { %v2840_v20 = vpop.permute.xlu1 %359  ;;  %v2842_v52 = vpop.permute.xlu0 %363 }
 0x146   : > { %v961_v50 = vcombine.low %v905_v24, %v921_v17  ;;  %1794 = vrot.lane.b32.xlu1 %v2836_v2, %s2401_s30  ;;  %v962_v4 = vcombine.high %v905_v24, %v921_v17  ;;  %v1341_v51 = vcombine.low %v2821_v53, %v2842_v52  ;;  %v944_v24 = vrot.slane %v3679_v49, %v2753_v5 }
 0x148   : > { %v2855_v7 = vrot.slane %v961_v50, %v2753_v5  ;;  %v1678_v50 = vcombine.high %v2756_v34, %v3626_v0  ;;  %v976_v34 = vrot.slane %v962_v4, %v2753_v5  ;;  %v1349_v4 = vrot.slane %v1341_v51, %v2560_v28 }
 0x149   : > { %v2857_v55 = vpop.permute.xlu1 %367  ;;  %v2859_v48 = vpop.permute.xlu0 %379 }
 0x14a   : > { %3678 = vst [vmem:[#allocation22_spill] sm:$0xff] %v2855_v7  ;;  %1694 = vrot.lane.b32.xlu1 %v1065_v54, %s2402_s4  ;;  %v994_v57 = vcombine.high %v2852_v23, %v2855_v7  ;;  %v1357_v19 = vcombine.low %v2840_v20, %v2857_v55 }
 0x14c   : > { %1692 = vrot.lane.b32.xlu0 %v994_v57, %s2402_s4  ;;  %v1607_v57 = vcombine.low %v1556_v16, %v1588_v3  ;;  %v1365_v18 = vrot.slane %v1357_v19, %v2560_v28  ;;  %v898_v16 = vcombine.high %v2786_v56, %v2801_v63  ;;  %v3682_v56 = vmov 0.0  }
 0x14d   : > { %v2876_v17 = vpop.permute.xlu1 %383  ;;  %v2878_v54 = vpop.permute.xlu0 %387  ;;  %v1679_v63 = vcombine.high %v2797_v6, %v3682_v56 }
 0x14e   : > { %1874 = vrot.lane.b32.xlu1 %v1678_v50, %s2404_s6  ;;  %v1373_v39 = vcombine.low %v2859_v48, %v2878_v54  ;;  %v1405_v60 = vcombine.low %v1349_v4, %v1365_v18  ;;  %v2943_v35 = vrot.slane %v898_v16, %v2560_v28 }
 0x150   : > { %1852 = vrot.lane.b32.xlu0 %v1607_v57, %s2400_s29  ;;  %v995_v57 = vcombine.low %v944_v24, %v976_v34  ;;  %v1381_v36 = vrot.slane %v1373_v39, %v2560_v28  ;;  %v2911_v51 = vrot.slane %v1405_v60, %v2753_v5  ;;  %v914_v39 = vcombine.high %v2799_v58, %v2819_v21 }
 0x151   : > { %v2894_v26 = vpop.permute.xlu1 %391  ;;  %v2896_v50 = vpop.permute.xlu0 %353  ;;  %3683 = vst [vmem:[#allocation25_spill] sm:$0xff] %v2943_v35 }
 0x152   : > { %v1389_v19 = vcombine.low %v2876_v17, %v2894_v26  ;;  %1734 = vrot.lane.b32.xlu1 %v1066_v41, %s2404_s6  ;;  %3680 = vst [vmem:[#allocation23_spill] sm:$0xff] %v2911_v51  ;;  %v2932_v58 = vrot.slane %v914_v39, %v2560_v28 }
 0x154   : > { %v1397_v0 = vrot.slane %v1389_v19, %v2560_v28  ;;  %1712 = vrot.lane.b32.xlu0 %v995_v57, %s2400_s29 }
 0x155   : > { %v2905_v9 = vpop.permute.xlu1 %357  ;;  %v2907_v49 = vpop.permute.xlu0 %361 }
 0x156   : > { %v1437_v7 = vcombine.low %v1381_v36, %v1397_v0  ;;  %1872 = vrot.lane.b32.xlu1 %v1608_v8, %s2404_s6  ;;  %v1438_v23 = vcombine.high %v1381_v36, %v1397_v0  ;;  %v729_v1 = vcombine.low %v2896_v50, %v2907_v49  ;;  %v1526_v0 = vcombine.high %v2770_v61, %v2784_v43 }
 0x157   : > { %v977_v36 = vcombine.low %v2943_v35, %v2932_v58 }
 0x158   : > { %v2914_v41 = vrot.slane %v1437_v7, %v2753_v5 }
 0x159   : > { %v2918_v19 = vpop.permute.xlu1 %365  ;;  %v2920_v57 = vpop.permute.xlu0 %377 }
 0x15a   : > { %3681 = vst [vmem:[#allocation24_spill] sm:$0xff] %v2914_v41  ;;  %v1470_v3 = vcombine.high %v2911_v51, %v2914_v41  ;;  %v745_v60 = vcombine.low %v2905_v9, %v2918_v19  ;;  %v2963_v41 = vrot.slane %v1438_v23, %v2753_v5  ;;  %v2979_v23 = vrot.slane %v1526_v0, %v2560_v28 }
 0x15c   : > { %1830 = vrot.lane.b32.xlu0 %v1470_v3, %s2402_s4  ;;  %v1406_v3 = vcombine.high %v1349_v4, %v1365_v18  ;;  %v2946_v7 = vrot.slane %v745_v60, %v2560_v28  ;;  %v737_v18 = vrot.slane %v729_v1, %v2560_v28  ;;  %v996_v60 = vcombine.high %v944_v24, %v976_v34 }
 0x15d   : > { %v2934_v21 = vpop.permute.xlu1 %381  ;;  %v2936_v8 = vpop.permute.xlu0 %385 }
 0x15e   : > { %v761_v39 = vcombine.low %v2920_v57, %v2936_v8  ;;  %v793_v61 = vcombine.low %v737_v18, %v2946_v7  ;;  %v2972_v1 = vrot.slane %v1406_v3, %v2753_v5 }
 0x160   : > { %1914 = vrot.lane.b32.xlu0 %v1679_v63, %s2405_s7  ;;  %v1510_v63 = vcombine.high %v2758_v38, %v2772_v62  ;;  %v769_v43 = vrot.slane %v761_v39, %v2560_v28  ;;  %v1471_v38 = vcombine.low %v2972_v1, %v2963_v41  ;;  %v2984_v62 = vrot.slane %v977_v36, %v2753_v5 }
 0x161   : > { %v2955_v6 = vpop.permute.xlu1 %389  ;;  %v2957_v16 = vpop.permute.xlu0 %323  ;;  %v3687_v39 = vcombine.low %v2634_v10, %v2637_v11  ;;  %v794_v10 = vcombine.high %v737_v18, %v2946_v7 }
 0x162   : > { %3684 = vst [vmem:[#allocation26_spill] sm:$0xff] %v2957_v16  ;;  %v777_v4 = vcombine.low %v2934_v21, %v2955_v6 }
 0x163   : > { %v2990_v3 = vrot.slane %v3687_v39, %v2753_v5 }
 0x164   : > { %v785_v51 = vrot.slane %v777_v4, %v2560_v28  ;;  %1732 = vrot.lane.b32.xlu0 %v996_v60, %s2404_s6  ;;  %v2993_v4 = vrot.slane %v1510_v63, %v2560_v28  ;;  %v2999_v60 = vrot.slane %v793_v61, %v2753_v5 }
 0x165   : > { %v2974_v15 = vpop.permute.xlu1 %327  ;;  %v2976_v24 = vpop.permute.xlu0 %331  ;;  %v997_v61 = vcombine.low %v2990_v3, %v2984_v62 }
 0x166   : > { %3685 = vst [vmem:[#allocation27_spill] sm:$0xff] %v2974_v15  ;;  %3686 = vst [vmem:[#allocation28_spill] sm:$0xff] %v2976_v24  ;;  %v825_v34 = vcombine.low %v769_v43, %v785_v51  ;;  %v1205_v0 = vcombine.low %v2957_v16, %v2976_v24  ;;  %v1589_v39 = vcombine.low %v2993_v4, %v2979_v23 }
 0x167   : > { %3688 = vst [vmem:[#allocation29_spill] sm:$0xff] %v2999_v60 }
 0x168   : > { %1850 = vrot.lane.b32.xlu0 %v1471_v38, %s2400_s29  ;;  %v3002_v36 = vrot.slane %v825_v34, %v2753_v5  ;;  %v3017_v38 = vrot.slane %v1205_v0, %v2560_v28  ;;  %v1067_v0 = vcombine.high %v2814_v37, %v3682_v56  ;;  %v3693_v37 = vcombine.low %v2592_v44, %v2598_v46 }
 0x169   : > { %v3004_v14 = vpop.permute.xlu1 %335  ;;  %v3006_v47 = vpop.permute.xlu0 %321 }
 0x16a   : > { %3689 = vst [vmem:[#allocation30_spill] sm:$0xff] %v3002_v36  ;;  %3690 = vst [vmem:[#allocation31_spill] sm:$0xff] %v3004_v14  ;;  %v1221_v63 = vcombine.low %v2974_v15, %v3004_v14  ;;  %v858_v45 = vcombine.high %v2999_v60, %v3002_v36  ;;  %v826_v14 = vcombine.high %v769_v43, %v785_v51 }
 0x16b   : > { %3691 = vst [vmem:[#allocation32_spill] sm:$0xff] %v3006_v47  ;;  %v3050_v43 = vrot.slane %v3693_v37, %v2753_v5  ;;  %v3072_v36 = vrot.slane %v794_v10, %v2753_v5  ;;  %v1069_v60 = vcombine.low %v2699_v22, %v2706_v27 }
 0x16c   : > { %v3020_v34 = vrot.slane %v1221_v63, %v2560_v28  ;;  %1690 = vrot.lane.b32.xlu1 %v858_v45, %s2402_s4  ;;  %1752 = vrot.lane.b32.xlu0 %v997_v61, %s2403_s5  ;;  %v1597_v63 = vrot.slane %v1589_v39, %v2753_v5  ;;  %v3692_v45 = vcombine.low %v2583_v40, %v2589_v42 }
 0x16d   : > { %v3024_v16 = vpop.permute.xlu1 %325  ;;  %v3026_v24 = vpop.permute.xlu0 %329  ;;  %3694 = vst [vmem:[#allocation33_spill] sm:$0xff] %v3050_v43 }
 0x16e   : > { %v1269_v11 = vcombine.low %v3017_v38, %v3020_v34  ;;  %v1565_v61 = vrot.slane %v3692_v45, %v2753_v5  ;;  %v593_v35 = vcombine.low %v3006_v47, %v3026_v24 }
 0x170   : > { %1774 = vrot.lane.b32.xlu1 %v1067_v0, %s2405_s7  ;;  %v3044_v51 = vrot.slane %v1269_v11, %v2753_v5  ;;  %v1609_v18 = vcombine.low %v1565_v61, %v1597_v63  ;;  %v3061_v11 = vrot.slane %v826_v14, %v2753_v5  ;;  %v3064_v45 = vrot.slane %v593_v35, %v2560_v28 }
 0x171   : > { %v3052_v39 = vpop.permute.xlu1 %333  ;;  %v3054_v15 = vpop.permute.xlu0 %299  ;;  %v1085_v14 = vcombine.low %v2704_v25, %v2712_v29  ;;  %v457_v35 = vcombine.low %v2714_v30, %v2722_v32  ;;  %v1610_v22 = vcombine.high %v1565_v61, %v1597_v63  ;;  %v473_v25 = vcombine.low %v2720_v31, %v2728_v33 }
 0x172   : > { %v609_v7 = vcombine.low %v3024_v16, %v3052_v39  ;;  %v1334_v0 = vcombine.high %v3044_v51, %v3050_v43  ;;  %v3695_v30 = vcombine.high %v2592_v44, %v2598_v46  ;;  %v3696_v63 = vcombine.low %v2640_v12, %v2643_v13 }
 0x173   : > { %v3112_v44 = vrot.slane %v1069_v60, %v2560_v28  ;;  %v3115_v46 = vrot.slane %v1085_v14, %v2560_v28  ;;  %v1472_v14 = vcombine.high %v2972_v1, %v2963_v41  ;;  %v3135_v43 = vrot.slane %v473_v25, %v2560_v28 }
 0x174   : > { %v3067_v37 = vrot.slane %v609_v7, %v2560_v28  ;;  %1892 = vrot.lane.b32.xlu1 %v1609_v18, %s2403_s5  ;;  %1828 = vrot.lane.b32.xlu0 %v1334_v0, %s2402_s4  ;;  %v859_v0 = vcombine.low %v3072_v36, %v3061_v11  ;;  %v3096_v32 = vrot.slane %v3695_v30, %v2753_v5 }
 0x175   : > { %v3080_v47 = vpop.permute.xlu1 %303  ;;  %v3082_v7 = vpop.permute.xlu0 %307  ;;  %v3109_v61 = vrot.slane %v3696_v63, %v2753_v5  ;;  %v3118_v30 = vrot.slane %v457_v35, %v2560_v28  ;;  %v1270_v63 = vcombine.high %v3017_v38, %v3020_v34  ;;  %v1680_v38 = vcombine.high %v2765_v59, %v3682_v56 }
 0x176   : > { %v657_v10 = vcombine.low %v3064_v45, %v3067_v37  ;;  %v1101_v29 = vcombine.low %v3054_v15, %v3082_v7  ;;  %v1374_v34 = vcombine.high %v2859_v48, %v2878_v54  ;;  %v746_v25 = vcombine.high %v2905_v9, %v2918_v19 }
 0x177   : > { %v762_v59 = vcombine.high %v2920_v57, %v2936_v8  ;;  %v1590_v9 = vcombine.high %v2993_v4, %v2979_v23  ;;  %v730_v19 = vcombine.high %v2896_v50, %v2907_v49  ;;  %v1133_v8 = vcombine.low %v3112_v44, %v3115_v46 }
 0x178   : > { %1710 = vrot.lane.b32.xlu1 %v859_v0, %s2400_s29  ;;  %1912 = vrot.lane.b32.xlu0 %v1610_v22, %s2405_s7  ;;  %v3103_v18 = vrot.slane %v657_v10, %v2753_v5  ;;  %v1390_v22 = vcombine.high %v2876_v17, %v2894_v26  ;;  %v1358_v26 = vcombine.high %v2840_v20, %v2857_v55 }
 0x179   : > { %v3122_v10 = vpop.permute.xlu1 %311  ;;  %v3124_v0 = vpop.permute.xlu0 %297  ;;  %v778_v17 = vcombine.high %v2934_v21, %v2955_v6  ;;  %v3146_v41 = vrot.slane %v1101_v29, %v2560_v28  ;;  %v1342_v20 = vcombine.high %v2821_v53, %v2842_v52  ;;  %v998_v52 = vcombine.high %v2990_v3, %v2984_v62 }
 0x17a   : > { %v1117_v60 = vcombine.low %v3080_v47, %v3122_v10  ;;  %v722_v35 = vcombine.high %v3103_v18, %v3109_v61  ;;  %v721_v48 = vcombine.low %v3103_v18, %v3109_v61  ;;  %v3166_v54 = vrot.slane %v1390_v22, %v2560_v28 }
 0x17b   : > { %v3173_v53 = vrot.slane %v1270_v63, %v2753_v5  ;;  %v3180_v57 = vrot.slane %v778_v17, %v2560_v28  ;;  %v3185_v6 = vrot.slane %v1358_v26, %v2560_v28  ;;  %v3188_v62 = vrot.slane %v1374_v34, %v2560_v28 }
 0x17c   : > { %v3149_v1 = vrot.slane %v1117_v60, %v2560_v28  ;;  %1870 = vrot.lane.b32.xlu1 %v1472_v14, %s2404_s6  ;;  %1688 = vrot.lane.b32.xlu0 %v722_v35, %s2402_s4  ;;  %v3195_v50 = vrot.slane %v1342_v20, %v2560_v28  ;;  %v3198_v49 = vrot.slane %v746_v25, %v2560_v28 }
 0x17d   : > { %v3159_v55 = vpop.permute.xlu1 %301  ;;  %v3161_v29 = vpop.permute.xlu0 %305  ;;  %v3201_v23 = vrot.slane %v762_v59, %v2560_v28  ;;  %v1453_v63 = vcombine.low %v3188_v62, %v3166_v54  ;;  %v860_v14 = vcombine.high %v3072_v36, %v3061_v11  ;;  %v1335_v35 = vcombine.low %v3173_v53, %v3096_v32 }
 0x17e   : > { %v1165_v21 = vcombine.low %v3146_v41, %v3149_v1  ;;  %v489_v3 = vcombine.low %v3124_v0, %v3161_v29  ;;  %v3217_v26 = vrot.slane %v730_v19, %v2560_v28  ;;  %v3223_v34 = vrot.slane %v1133_v8, %v2753_v5 }
 0x17f   : > { %v841_v17 = vcombine.low %v3201_v23, %v3180_v57  ;;  %v1421_v20 = vcombine.low %v3195_v50, %v3185_v6  ;;  %v3697_v59 = vcombine.high %v2583_v40, %v2589_v42  ;;  %v658_v19 = vcombine.high %v3064_v45, %v3067_v37 }
 0x180   : > { %1954 = vrot.lane.b32.xlu1 %v1680_v38, %s2406_s8  ;;  %1772 = vrot.lane.b32.xlu0 %v998_v52, %s2405_s7  ;;  %v3206_v22 = vrot.slane %v1165_v21, %v2753_v5  ;;  %v1604_v38 = vrot.slane %v1590_v9, %v2753_v5  ;;  %v3228_v25 = vrot.slane %v489_v3, %v2560_v28 }
 0x181   : > { %v3203_v4 = vpop.permute.xlu1 %309  ;;  %v809_v11 = vcombine.low %v3217_v26, %v3198_v49  ;;  %v1572_v21 = vrot.slane %v3697_v59, %v2753_v5  ;;  %v521_v52 = vcombine.low %v3118_v30, %v3135_v43  ;;  %v1068_v3 = vcombine.high %v2836_v2, %v3682_v56  ;;  %v3698_v2 = vld [vmem:[#allocation25_spill] sm:$0xff] }
 0x182   : > { %v505_v60 = vcombine.low %v3159_v55, %v3203_v4  ;;  %v1197_v9 = vcombine.low %v3223_v34, %v3206_v22  ;;  %v849_v40 = vrot.slane %v841_v17, %v2753_v5  ;;  %v978_v56 = vcombine.high %v3698_v2, %v2932_v58 }
 0x183   : > { %v817_v45 = vrot.slane %v809_v11, %v2753_v5  ;;  %v3261_v37 = vrot.slane %v521_v52, %v2753_v5  ;;  %v672_v17 = vrot.slane %v658_v19, %v2753_v5  ;;  %v1198_v58 = vcombine.high %v3223_v34, %v3206_v22  ;;  %v3700_v19 = vld [vmem:[#allocation8_spill] sm:$0xff] }
 0x184   : > { %v3231_v36 = vrot.slane %v505_v60, %v2560_v28  ;;  %1730 = vrot.lane.b32.xlu1 %v860_v14, %s2404_s6  ;;  %1848 = vrot.lane.b32.xlu0 %v1335_v35, %s2400_s29  ;;  %v1461_v60 = vrot.slane %v1453_v63, %v2753_v5  ;;  %v1611_v14 = vcombine.low %v1572_v21, %v1604_v38 }
 0x185   : > { %v1429_v35 = vrot.slane %v1421_v20, %v2753_v5  ;;  %v861_v59 = vcombine.low %v817_v45, %v849_v40  ;;  %v3699_v20 = vcombine.high %v2640_v12, %v2643_v13  ;;  %v3703_v13 = vld [vmem:[#allocation31_spill] sm:$0xff] }
 0x186   : > { %v553_v8 = vcombine.low %v3228_v25, %v3231_v36 }
 0x187   : > { %v1473_v63 = vcombine.low %v1429_v35, %v1461_v60  ;;  %v704_v11 = vrot.slane %v3699_v20, %v2753_v5  ;;  %v1474_v12 = vcombine.high %v1429_v35, %v1461_v60  ;;  %v1336_v20 = vcombine.high %v3173_v53, %v3096_v32  ;;  %v3705_v60 = vld [vmem:[#allocation28_spill] sm:$0xff]  ;;  %v3706_v35 = vld [vmem:[#allocation26_spill] sm:$0xff] }
 0x188   : > { %v3254_v42 = vrot.slane %v553_v8, %v2753_v5  ;;  %1814 = vrot.lane.b32.xlu1 %v1068_v3, %s2406_s8  ;;  %1932 = vrot.lane.b32.xlu0 %v1611_v14, %s2401_s30  ;;  %v992_v3 = vrot.slane %v978_v56, %v2753_v5  ;;  %v3701_v14 = vld [vmem:[#allocation9_spill] sm:$0xff]  ;;  %v3704_v56 = vld [vmem:[#allocation27_spill] sm:$0xff]  ;;  %v1134_v32 = vcombine.high %v3112_v44, %v3115_v46 }
 0x189   : > { %v723_v52 = vcombine.low %v672_v17, %v704_v11  ;;  %v3702_v2 = vcombine.high %v3700_v19, %v3701_v14  ;;  %v1166_v19 = vcombine.high %v3146_v41, %v3149_v1  ;;  %v3707_v14 = vld [vmem:[#allocation32_spill] sm:$0xff]  ;;  %v1454_v41 = vcombine.high %v3188_v62, %v3166_v54 }
 0x18a   : > { %v1422_v44 = vcombine.high %v3195_v50, %v3185_v6  ;;  %v1148_v54 = vrot.slane %v1134_v32, %v2753_v5 }
 0x18b   : > { %v1180_v53 = vrot.slane %v1166_v19, %v2753_v5 }
 0x18c   : > { %1890 = vrot.lane.b32.xlu1 %v1473_v63, %s2403_s5  ;;  %1750 = vrot.lane.b32.xlu0 %v861_v59, %s2403_s5  ;;  %v960_v63 = vrot.slane %v3702_v2, %v2753_v5  ;;  %v1222_v59 = vcombine.high %v3704_v56, %v3703_v13  ;;  %v594_v2 = vcombine.high %v3707_v14, %v3026_v24 }
 0x18d   : > { %v1436_v6 = vrot.slane %v1422_v44, %v2753_v5  ;;  %v554_v13 = vcombine.high %v3228_v25, %v3231_v36  ;;  %v1102_v44 = vcombine.high %v3054_v15, %v3082_v7 }
 0x18e   : > { %v999_v8 = vcombine.low %v960_v63, %v992_v3  ;;  %v3319_v46 = vrot.slane %v594_v2, %v2560_v28  ;;  %v1000_v56 = vcombine.high %v960_v63, %v992_v3  ;;  %v842_v3 = vcombine.high %v3201_v23, %v3180_v57  ;;  %v3715_v57 = vld [vmem:[#allocation14_spill] sm:$0xff]  ;;  %v3716_v23 = vld [vmem:[#allocation13_spill] sm:$0xff] }
 0x18f   : > { %v568_v63 = vrot.slane %v554_v13, %v2753_v5  ;;  %v1118_v2 = vcombine.high %v3080_v47, %v3122_v10 }
 0x190   : > { %1708 = vrot.lane.b32.xlu1 %v723_v52, %s2400_s29  ;;  %1826 = vrot.lane.b32.xlu0 %v1198_v58, %s2402_s4  ;;  %v610_v52 = vcombine.high %v3024_v16, %v3052_v39  ;;  %v586_v58 = vcombine.high %v3261_v37, %v3254_v42  ;;  %v3304_v16 = vrot.slane %v1222_v59, %v2560_v28  ;;  %v3708_v59 = vld [vmem:[#allocation6_spill] sm:$0xff] }
 0x191   : > { %v1612_v39 = vcombine.high %v1572_v21, %v1604_v38  ;;  %v724_v38 = vcombine.high %v672_v17, %v704_v11  ;;  %v1468_v21 = vrot.slane %v1454_v41, %v2753_v5  ;;  %v856_v47 = vrot.slane %v842_v3, %v2753_v5 }
 0x192   : > { %v3309_v1 = vrot.slane %v610_v52, %v2560_v28 }
 0x193   : > { %v1475_v11 = vcombine.low %v1436_v6, %v1468_v21 }
 0x194   : > { %1792 = vrot.lane.b32.xlu1 %v999_v8, %s2401_s30  ;;  %1910 = vrot.lane.b32.xlu0 %v1474_v12, %s2405_s7  ;;  %v1206_v8 = vcombine.high %v3706_v35, %v3705_v60  ;;  %v862_v12 = vcombine.high %v817_v45, %v849_v40  ;;  %v673_v40 = vcombine.low %v3319_v46, %v3309_v1  ;;  %v3711_v60 = vld [vmem:[#allocation10_spill] sm:$0xff]  ;;  %v3712_v35 = vld [vmem:[#allocation11_spill] sm:$0xff] }
 0x195   : > { %v1199_v45 = vcombine.low %v1148_v54, %v1180_v53  ;;  %v3713_v25 = vcombine.low %v3711_v60, %v3712_v35 }
 0x196   : > { %v3313_v24 = vrot.slane %v1206_v8, %v2560_v28  ;;  %v681_v17 = vrot.slane %v673_v40, %v2753_v5  ;;  %v3718_v40 = vld [vmem:[#allocation15_spill] sm:$0xff] }
 0x197   : > { %v713_v36 = vrot.slane %v3713_v25, %v2753_v5 }
 0x198   : > { %1868 = vrot.lane.b32.xlu1 %v1336_v20, %s2404_s6  ;;  %1686 = vrot.lane.b32.xlu0 %v586_v58, %s2402_s4  ;;  %v1285_v62 = vcombine.low %v3313_v24, %v3304_v16  ;;  %v3709_v20 = vld [vmem:[#allocation7_spill] sm:$0xff]  ;;  %v522_v58 = vcombine.high %v3118_v30, %v3135_v43  ;;  %v3714_v43 = vld [vmem:[#allocation12_spill] sm:$0xff] }
 0x199   : > { %v3710_v52 = vcombine.low %v3708_v59, %v3709_v20  ;;  %v725_v32 = vcombine.low %v681_v17, %v713_v36  ;;  %v1070_v30 = vcombine.high %v3714_v43, %v2706_v27  ;;  %v3367_v27 = vrot.slane %v1118_v2, %v2560_v28 }
 0x19a   : > { %v1293_v50 = vrot.slane %v1285_v62, %v2753_v5  ;;  %v536_v41 = vrot.slane %v522_v58, %v2753_v5 }
 0x19b   : > { %v1325_v19 = vrot.slane %v3710_v52, %v2753_v5  ;;  %v3372_v62 = vrot.slane %v1070_v30, %v2560_v28  ;;  %v1476_v52 = vcombine.high %v1436_v6, %v1468_v21 }
 0x19c   : > { %1952 = vrot.lane.b32.xlu1 %v1612_v39, %s2406_s8  ;;  %1770 = vrot.lane.b32.xlu0 %v862_v12, %s2405_s7  ;;  %v810_v39 = vcombine.high %v3217_v26, %v3198_v49  ;;  %v1086_v12 = vcombine.high %v3716_v23, %v3715_v57  ;;  %v587_v10 = vcombine.low %v536_v41, %v568_v63 }
 0x19d   : > { %v1337_v14 = vcombine.low %v1293_v50, %v1325_v19  ;;  %v506_v49 = vcombine.high %v3159_v55, %v3203_v4  ;;  %v1200_v26 = vcombine.high %v1148_v54, %v1180_v53  ;;  %v1116_v55 = vrot.slane %v1102_v44, %v2560_v28 }
 0x19e   : > { %v824_v15 = vrot.slane %v810_v39, %v2753_v5  ;;  %v1100_v13 = vrot.slane %v1086_v12, %v2560_v28  ;;  %v490_v4 = vcombine.high %v3124_v0, %v3161_v29  ;;  %v1338_v3 = vcombine.high %v1293_v50, %v1325_v19 }
 0x19f   : > { %v1181_v54 = vcombine.low %v1116_v55, %v3367_v27  ;;  %v588_v19 = vcombine.high %v536_v41, %v568_v63  ;;  %v674_v63 = vcombine.high %v3319_v46, %v3309_v1  ;;  %v3723_v1 = vld [vmem:[#allocation21_spill] sm:$0xff]  ;;  %v3724_v46 = vld [vmem:[#allocation22_spill] sm:$0xff] }
 0x1a0   : > { %1728 = vrot.lane.b32.xlu1 %v724_v38, %s2404_s6  ;;  %1846 = vrot.lane.b32.xlu0 %v1199_v45, %s2400_s29  ;;  %v3717_v38 = vld [vmem:[#allocation16_spill] sm:$0xff]  ;;  %v863_v53 = vcombine.low %v824_v15, %v856_v47  ;;  %v504_v0 = vrot.slane %v490_v4, %v2560_v28  ;;  %v1149_v29 = vcombine.low %v3372_v62, %v1100_v13 }
 0x1a1   : > { %v458_v45 = vcombine.high %v3718_v40, %v3717_v38  ;;  %v1189_v21 = vrot.slane %v1181_v54, %v2753_v5  ;;  %v864_v41 = vcombine.high %v824_v15, %v856_v47  ;;  %v3725_v47 = vcombine.low %v3723_v1, %v3724_v46  ;;  %v3734_v46 = vld [vmem:[#allocation33_spill] sm:$0xff] }
 0x1a2   : > { %v1157_v2 = vrot.slane %v1149_v29, %v2753_v5  ;;  %v1150_v4 = vcombine.high %v3372_v62, %v1100_v13 }
 0x1a4   : > { %1812 = vrot.lane.b32.xlu1 %v1000_v56, %s2406_s8  ;;  %1930 = vrot.lane.b32.xlu0 %v1475_v11, %s2401_s30  ;;  %v3350_v8 = vpop.permute.xlu0 %1854  ;;  %v474_v56 = vcombine.high %v2720_v31, %v2728_v33  ;;  %v3389_v11 = vrot.slane %v506_v49, %v2560_v28  ;;  %v3395_v31 = vrot.slane %v458_v45, %v2560_v28 }
 0x1a5   : > { %v1201_v23 = vcombine.low %v1157_v2, %v1189_v21  ;;  %v1182_v45 = vcombine.high %v1116_v55, %v3367_v27  ;;  %v1164_v29 = vrot.slane %v1150_v4, %v2753_v5 }
 0x1a6   : > { %v3398_v33 = vrot.slane %v474_v56, %v2560_v28  ;;  %v569_v6 = vcombine.low %v504_v0, %v3389_v11  ;;  %v1202_v56 = vcombine.high %v1157_v2, %v1189_v21 }
 0x1a7   : > { %v1196_v54 = vrot.slane %v1182_v45, %v2753_v5  ;;  %v3733_v45 = vld [vmem:[#allocation17_spill] sm:$0xff] }
 0x1a8   : > { %1888 = vrot.lane.b32.xlu1 %v1337_v14, %s2403_s5  ;;  %1748 = vrot.lane.b32.xlu0 %v725_v32, %s2403_s5  ;;  %v3377_v7 = vpop.permute.xlu0 %1934  ;;  %v726_v14 = vcombine.high %v681_v17, %v713_v36  ;;  %v537_v28 = vcombine.low %v3395_v31, %v3398_v33  ;;  %v1286_v32 = vcombine.high %v3313_v24, %v3304_v16  ;;  %v3719_v17 = vld [vmem:[#allocation18_spill] sm:$0xff]  ;;  %v3720_v36 = vld [vmem:[#allocation19_spill] sm:$0xff] }
 0x1a9   : > { %v577_v30 = vrot.slane %v569_v6, %v2753_v5  ;;  %v3721_v39 = vcombine.low %v3719_v17, %v3720_v36  ;;  %v1203_v13 = vcombine.low %v1164_v29, %v1196_v54  ;;  %v538_v6 = vcombine.high %v3395_v31, %v3398_v33 }
 0x1aa   : > { %v545_v16 = vrot.slane %v537_v28, %v2753_v5  ;;  %v1300_v24 = vrot.slane %v1286_v32, %v2753_v5  ;;  %v1204_v28 = vcombine.high %v1164_v29, %v1196_v54 }
 0x1ac   : > { %1706 = vrot.lane.b32.xlu1 %v587_v10, %s2400_s29  ;;  %1866 = vrot.lane.b32.xlu0 %v1200_v26, %s2404_s6  ;;  %v3391_v58 = vpop.permute.xlu1 %1714  ;;  %v3403_v25 = vpop.permute.xlu0 %1834  ;;  %v589_v12 = vcombine.low %v545_v16, %v577_v30  ;;  %v3722_v10 = vcombine.high %v3708_v59, %v3709_v20  ;;  %v688_v26 = vrot.slane %v674_v63, %v2753_v5  ;;  %v3730_v63 = vld [vmem:[#allocation29_spill] sm:$0xff] }
 0x1ad   : > { %v3726_v59 = vcombine.high %v3711_v60, %v3712_v35  ;;  %v570_v60 = vcombine.high %v504_v0, %v3389_v11  ;;  %v552_v11 = vrot.slane %v538_v6, %v2753_v5  ;;  %v2007_v1 = vsel %vm1961_vm3, %v3733_v45, %v3403_v25 }
 0x1ae   : > { %v1332_v49 = vrot.slane %v3722_v10, %v2753_v5 }
 0x1af   : > { %v720_v20 = vrot.slane %v3726_v59, %v2753_v5 }
 0x1b0   : > { %1790 = vrot.lane.b32.xlu1 %v863_v53, %s2401_s30  ;;  %1950 = vrot.lane.b32.xlu0 %v1476_v52, %s2406_s8  ;;  %v3414_v43 = vpop.permute.xlu1 %1894  ;;  %v1339_v40 = vcombine.low %v1300_v24, %v1332_v49  ;;  %v590_v52 = vcombine.high %v545_v16, %v577_v30  ;;  %v3728_v30 = vld [vmem:[#allocation24_spill] sm:$0xff] }
 0x1b1   : > { %v727_v55 = vcombine.low %v688_v26, %v720_v20  ;;  %v728_v2 = vcombine.high %v688_v26, %v720_v20 }
 0x1b4   : > { %1908 = vrot.lane.b32.xlu1 %v1338_v3, %s2405_s7  ;;  %1768 = vrot.lane.b32.xlu0 %v726_v14, %s2405_s7  ;;  %v3429_v44 = vpop.permute.xlu1 %1754  ;;  %v1340_v3 = vcombine.high %v1300_v24, %v1332_v49  ;;  %v584_v14 = vrot.slane %v570_v60, %v2753_v5 }
 0x1b6   : > { %v1833_v50 = vpop.permute.xlu0 %1832  ;;  %v592_v36 = vcombine.high %v552_v11, %v584_v14 }
 0x1b7   : > { %v3421_v57 = vsel %vm1961_vm3, %v3721_v39, %v1833_v50  ;;  %v591_v50 = vcombine.low %v552_v11, %v584_v14 }
 0x1b8   : > { %1726 = vrot.lane.b32.xlu1 %v588_v19, %s2404_s6  ;;  %1886 = vrot.lane.b32.xlu0 %v1201_v23, %s2403_s5  ;;  %v3450_v53 = vpop.permute.xlu1 %1794  ;;  %v3727_v19 = vld [vmem:[#allocation23_spill] sm:$0xff] }
 0x1b9   : > { %v3729_v17 = vcombine.low %v3727_v19, %v3728_v30 }
 0x1bc   : > { %1810 = vrot.lane.b32.xlu1 %v864_v41, %s2406_s8  ;;  %1746 = vrot.lane.b32.xlu0 %v589_v12, %s2403_s5  ;;  %v1695_v21 = vpop.permute.xlu1 %1694  ;;  %v3731_v41 = vld [vmem:[#allocation30_spill] sm:$0xff] }
 0x1bd   : > { %v3732_v12 = vcombine.low %v3730_v63, %v3731_v41 }
 0x1be   : > { %v1693_v38 = vpop.permute.xlu0 %1692 }
 0x1bf   : > { %v1965_v15 = vsel %vm1961_vm3, %v3725_v47, %v1693_v38  ;;  %v3735_v47 = vcombine.low %v3044_v51, %v3734_v46  ;;  %v3736_v51 = vld [vmem:[#allocation20_spill] sm:$0xff] }
 0x1c0   : > { %1928 = vrot.lane.b32.xlu1 %v1339_v40, %s2401_s30  ;;  %1906 = vrot.lane.b32.xlu0 %v1202_v56, %s2405_s7  ;;  %v1875_v0 = vpop.permute.xlu1 %1874  ;;  %v2012_v56 = vsel %vm1967_vm4, %v2007_v1, %v3350_v8 }
 0x1c1   : > { %v2017_v4 = vsel %vm1973_vm5, %v2012_v56, %v1875_v0 }
 0x1c2   : > { %v3452_v27 = vpop.permute.xlu0 %1852  ;;  %v2022_v25 = vsel %vm1979_vm6, %v2017_v4, %v3414_v43 }
 0x1c3   : > { %v2011_v19 = vsel %vm1967_vm4, %v3421_v57, %v3452_v27 }
 0x1c4   : > { %1788 = vrot.lane.b32.xlu1 %v727_v55, %s2401_s30  ;;  %1766 = vrot.lane.b32.xlu0 %v590_v52, %s2405_s7  ;;  %v1735_v39 = vpop.permute.xlu1 %1734  ;;  %v1966_v52 = vsel %vm1961_vm3, %v3736_v51, %v1695_v21 }
 0x1c5   : > { %v1972_v60 = vsel %vm1967_vm4, %v1966_v52, %v3391_v58 }
 0x1c6   : > { %v1713_v35 = vpop.permute.xlu0 %1712 }
 0x1c7   : > { %v3460_v62 = vsel %vm1967_vm4, %v1965_v15, %v1713_v35 }
 0x1c8   : > { %1948 = vrot.lane.b32.xlu1 %v1340_v3, %s2406_s8  ;;  %1926 = vrot.lane.b32.xlu0 %v1203_v13, %s2401_s30  ;;  %v1873_v5 = vpop.permute.xlu1 %1872  ;;  %v1978_v13 = vsel %vm1973_vm5, %v1972_v60, %v1735_v39 }
 0x1c9   : > { %v1984_v18 = vsel %vm1979_vm6, %v1978_v13, %v3429_v44 }
 0x1cc   : > { %1808 = vrot.lane.b32.xlu1 %v728_v2, %s2406_s8  ;;  %1946 = vrot.lane.b32.xlu0 %v1204_v28, %s2406_s8 }
 0x1ce   : > { %v1831_v32 = vpop.permute.xlu0 %1830 }
 0x1cf   : > { %v3474_v31 = vsel %vm1961_vm3, %v3729_v17, %v1831_v32  ;;  %v2016_v17 = vsel %vm1973_vm5, %v2011_v19, %v1873_v5 }
 0x1d0   : > { %1786 = vrot.lane.b32.xlu1 %v591_v50, %s2401_s30 }
 0x1d2   : > { %v1915_v33 = vpop.permute.xlu0 %1914 }
 0x1d3   : > { %v2027_v29 = vsel %vm1985_vm7, %v2022_v25, %v1915_v33 }
 0x1d4   : > { %1806 = vrot.lane.b32.xlu1 %v592_v36, %s2406_s8  ;;  %v2032_v3 = vsel %vm1991_vm8, %v2027_v29, %v3377_v7 }
 0x1d6   : > { %v1733_v23 = vpop.permute.xlu0 %1732 }
 0x1d7   : > { %v1977_v57 = vsel %vm1973_vm5, %v3460_v62, %v1733_v23 }
 0x1da   : > { %v3478_v16 = vpop.permute.xlu0 %1850 }
 0x1de   : > { %v1691_v24 = vpop.permute.xlu1 %1690  ;;  %v1753_v49 = vpop.permute.xlu0 %1752 }
 0x1df   : > { %v3484_v10 = vsel %vm1961_vm3, %v3732_v12, %v1691_v24  ;;  %v1983_v5 = vsel %vm1979_vm6, %v1977_v57, %v1753_v49 }
 0x1e2   : > { %v1775_v26 = vpop.permute.xlu1 %1774 }
 0x1e3   : > { %v1990_v6 = vsel %vm1985_vm7, %v1984_v18, %v1775_v26 }
 0x1e4   : > { %v1996_v14 = vsel %vm1991_vm8, %v1990_v6, %v3450_v53 }
 0x1e6   : > { %v1893_v38 = vpop.permute.xlu1 %1892  ;;  %v1829_v40 = vpop.permute.xlu0 %1828 }
 0x1e7   : > { %v3493_v15 = vsel %vm1961_vm3, %v3735_v47, %v1829_v40  ;;  %v2021_v53 = vsel %vm1979_vm6, %v2016_v17, %v1893_v38 }
 0x1ea   : > { %v3497_v59 = vpop.permute.xlu1 %1710  ;;  %v1913_v20 = vpop.permute.xlu0 %1912 }
 0x1eb   : > { %v2026_v36 = vsel %vm1985_vm7, %v2021_v53, %v1913_v20  ;;  %v2010_v20 = vsel %vm1967_vm4, %v3474_v31, %v3478_v16  ;;  %v1970_v31 = vsel %vm1967_vm4, %v3484_v10, %v3497_v59 }
 0x1ee   : > { %v1871_v55 = vpop.permute.xlu1 %1870  ;;  %v1689_v54 = vpop.permute.xlu0 %1688 }
 0x1ef   : > { %v3509_v8 = vsel %vm1961_vm3, %v721_v48, %v1689_v54  ;;  %v2015_v23 = vsel %vm1973_vm5, %v2010_v20, %v1871_v55 }
 0x1f2   : > { %v1955_v43 = vpop.permute.xlu1 %1954  ;;  %v1773_v35 = vpop.permute.xlu0 %1772 }
 0x1f3   : > { %v2037_v21 = vsel %vm1997_vm9, %v2032_v3, %v1955_v43  ;;  %v1989_v26 = vsel %vm1985_vm7, %v1983_v5, %v1773_v35 }
 0x1f4   : > { %2244 = vmatprep.subr.msk.mxu0 %vm2043_vm10, %v2037_v21 }
 0x1f6   : > { %v1731_v61 = vpop.permute.xlu1 %1730  ;;  %v3520_v48 = vpop.permute.xlu0 %1848 }
 0x1f7   : > { %v1976_v55 = vsel %vm1973_vm5, %v1970_v31, %v1731_v61  ;;  %v2009_v10 = vsel %vm1967_vm4, %v3493_v15, %v3520_v48 }
 0x1fa   : > { %v1815_v58 = vpop.permute.xlu1 %1814  ;;  %v1933_v2 = vpop.permute.xlu0 %1932 }
 0x1fb   : > { %v2002_v7 = vsel %vm1997_vm9, %v1996_v14, %v1815_v58  ;;  %v2031_v39 = vsel %vm1991_vm8, %v2026_v36, %v1933_v2 }
 0x1fc   : > { %2245 = vmatpush1.msk.msra.mxu0 %vm2043_vm10, %v2002_v7 }
 0x1fe   : > { %v1891_v28 = vpop.permute.xlu1 %1890  ;;  %v1751_v11 = vpop.permute.xlu0 %1750 }
 0x1ff   : > { %v2020_v49 = vsel %vm1979_vm6, %v2015_v23, %v1891_v28  ;;  %v1982_v35 = vsel %vm1979_vm6, %v1976_v55, %v1751_v11 }
 0x202   : > { %v1709_v0 = vpop.permute.xlu1 %1708  ;;  %v1827_v32 = vpop.permute.xlu0 %1826 }
 0x203   : > { %v1969_v11 = vsel %vm1967_vm4, %v3509_v8, %v1709_v0 }
 0x206   : > { %v1793_v50 = vpop.permute.xlu1 %1792  ;;  %v1911_v44 = vpop.permute.xlu0 %1910 }
 0x207   : > { %v1995_v38 = vsel %vm1991_vm8, %v1989_v26, %v1793_v50  ;;  %v2025_v4 = vsel %vm1985_vm7, %v2020_v49, %v1911_v44  ;;  %v2003_v50 = vsel %vm1961_vm3, %v1197_v9, %v1827_v32 }
 0x20a   : > { %v1869_v30 = vpop.permute.xlu1 %1868  ;;  %v3531_v33 = vpop.permute.xlu0 %1686 }
 0x20b   : > { %v2014_v61 = vsel %vm1973_vm5, %v2009_v10, %v1869_v30 }
 0x20e   : > { %v1953_v24 = vpop.permute.xlu1 %1952  ;;  %v1771_v63 = vpop.permute.xlu0 %1770 }
 0x20f   : > { %v2036_v41 = vsel %vm1997_vm9, %v2031_v39, %v1953_v24  ;;  %v1988_v3 = vsel %vm1985_vm7, %v1982_v35, %v1771_v63 }
 0x210   : > { %2074 = vmatprep.subr.mxu0 %v2036_v41  ;;  %v3737_v41 = vcombine.low %v3261_v37, %v3254_v42  ;;  %v2038_v42 = vld [vmem:[%s3620_s1] sm:$0xff] }
 0x212   : > { %v1729_v12 = vpop.permute.xlu1 %1728  ;;  %v1847_v27 = vpop.permute.xlu0 %1846 }
 0x213   : > { %v1975_v15 = vsel %vm1973_vm5, %v1969_v11, %v1729_v12  ;;  %v2008_v48 = vsel %vm1967_vm4, %v2003_v50, %v1847_v27  ;;  %v1962_v12 = vsel %vm1961_vm3, %v3737_v41, %v3531_v33 }
 0x216   : > { %v1813_v40 = vpop.permute.xlu1 %1812  ;;  %v1931_v45 = vpop.permute.xlu0 %1930 }
 0x217   : > { %v2001_v1 = vsel %vm1997_vm9, %v1995_v38, %v1813_v40  ;;  %v2030_v54 = vsel %vm1991_vm8, %v2025_v4, %v1931_v45 }
 0x218   : > { %2075 = vmatpush1.msra.mxu0 %v2001_v1 }
 0x21a   : > { %v1889_v46 = vpop.permute.xlu1 %1888  ;;  %v1749_v47 = vpop.permute.xlu0 %1748 }
 0x21b   : > { %v2019_v7 = vsel %vm1979_vm6, %v2014_v61, %v1889_v46  ;;  %v1981_v53 = vsel %vm1979_vm6, %v1975_v15, %v1749_v47 }
 0x21e   : > { %v1707_v56 = vpop.permute.xlu1 %1706  ;;  %v1867_v62 = vpop.permute.xlu0 %1866 }
 0x21f   : > { %v2013_v36 = vsel %vm1973_vm5, %v2008_v48, %v1867_v62  ;;  %v1968_v57 = vsel %vm1967_vm4, %v1962_v12, %v1707_v56 }
 0x222   : > { %v1791_v25 = vpop.permute.xlu1 %1790  ;;  %v1951_v51 = vpop.permute.xlu0 %1950 }
 0x223   : > { %v2035_v52 = vsel %vm1997_vm9, %v2030_v54, %v1951_v51  ;;  %v1994_v13 = vsel %vm1991_vm8, %v1988_v3, %v1791_v25 }
 0x224   : > { %2076 = vmatprep.subr.mxu0 %v2035_v52 }
 0x226   : > { %v1909_v29 = vpop.permute.xlu1 %1908  ;;  %v1769_v60 = vpop.permute.xlu0 %1768 }
 0x227   : > { %v2024_v28 = vsel %vm1985_vm7, %v2019_v7, %v1909_v29  ;;  %v1987_v8 = vsel %vm1985_vm7, %v1981_v53, %v1769_v60 }
 0x22a   : > { %v1727_v16 = vpop.permute.xlu1 %1726  ;;  %v1887_v43 = vpop.permute.xlu0 %1886 }
 0x22b   : > { %v2018_v22 = vsel %vm1979_vm6, %v2013_v36, %v1887_v43  ;;  %v1974_v5 = vsel %vm1973_vm5, %v1968_v57, %v1727_v16 }
 0x22e   : > { %v1811_v21 = vpop.permute.xlu1 %1810  ;;  %v1747_v18 = vpop.permute.xlu0 %1746 }
 0x22f   : > { %v2000_v6 = vsel %vm1997_vm9, %v1994_v13, %v1811_v21  ;;  %v1980_v26 = vsel %vm1979_vm6, %v1974_v5, %v1747_v18 }
 0x230   : > { %2077 = vmatpush1.msra.mxu0 %v2000_v6 }
 0x232   : > { %v1929_v58 = vpop.permute.xlu1 %1928  ;;  %v1907_v14 = vpop.permute.xlu0 %1906 }
 0x233   : > { %v2029_v44 = vsel %vm1991_vm8, %v2024_v28, %v1929_v58  ;;  %v2023_v34 = vsel %vm1985_vm7, %v2018_v22, %v1907_v14 }
 0x236   : > { %v1789_v59 = vpop.permute.xlu1 %1788  ;;  %v1767_v2 = vpop.permute.xlu0 %1766 }
 0x237   : > { %v1993_v9 = vsel %vm1991_vm8, %v1987_v8, %v1789_v59  ;;  %v1986_v38 = vsel %vm1985_vm7, %v1980_v26, %v1767_v2 }
 0x23a   : > { %v1949_v19 = vpop.permute.xlu1 %1948  ;;  %v1927_v30 = vpop.permute.xlu0 %1926 }
 0x23b   : > { %v2034_v17 = vsel %vm1997_vm9, %v2029_v44, %v1949_v19  ;;  %v2028_v32 = vsel %vm1991_vm8, %v2023_v34, %v1927_v30 }
 0x23c   : > { %2078 = vmatprep.subr.mxu0 %v2034_v17 }
 0x23e   : > { %v1809_v0 = vpop.permute.xlu1 %1808  ;;  %v1947_v39 = vpop.permute.xlu0 %1946 }
 0x23f   : > { %v1999_v24 = vsel %vm1997_vm9, %v1993_v9, %v1809_v0  ;;  %v2033_v63 = vsel %vm1997_vm9, %v2028_v32, %v1947_v39 }
 0x240   : > { %2079 = vmatpush1.msra.mxu0 %v1999_v24 }
 0x241   : > { %2080 = vmatprep.subr.mxu0 %v2033_v63 }
 0x242   : > { %v1787_v27 = vpop.permute.xlu1 %1786 }
 0x243   : > { %v1992_v40 = vsel %vm1991_vm8, %v1986_v38, %v1787_v27 }
 0x246   : > { %v1807_v45 = vpop.permute.xlu1 %1806 }
 0x247   : > { %v1998_v37 = vsel %vm1997_vm9, %v1992_v40, %v1807_v45 }
 0x248   : > { %2081 = vmatpush1.msra.mxu0 %v1998_v37 }
 0x249   : > { %2246 = vmatmul.mubr.msk.f32.vlgmr.msra.gmra.mxu0 %vm2039_vm11, %v2038_v42 }
 0x309   : > { %v2116_v33 = vpop.f32.mrf.mxu0 }
 0x30a   : > { %2121 = vst [vmem:[%s197_s19] sm:$0xff] %v2116_v33  ;;  %v2126_v46 = vmul.f32 %v2116_v33, %v2116_v33 }
 0x30b   : > { %v2118_v1 = vpop.f32.mrf.mxu0 }
 0x30c   : > { %2122 = vst [vmem:[%s197_s19 + $0x8] sm:$0xff] %v2118_v1  ;;  %v2123_v47 = vadd.f32 %v2118_v1, %v2116_v33  ;;  %v2127_v56 = vmul.f32 %v2118_v1, %v2118_v1 }
 0x30e   : > { %v2128_v20 = vadd.f32 %v2127_v56, %v2126_v46  ;;  %2124 = vadd.xlane.f32.xlu0 %v2123_v47 }
 0x310   : > { %2129 = vadd.xlane.f32.xlu1 %v2128_v20 }
 0x397   : > { %v2125_v62 = vpop.xlane.xlu0 %2124 }
 0x399   : > { %v2130_v23 = vpop.xlane.xlu1 %2129 }
 0x39a   : > { %v2132_v49 = vsel %vm2131_vm12, %v2125_v62, %v2130_v23 }
 0x39b   : > { %2134 = vst.msk [vmem:[%s201_s25] sm:$0xff] %vm2133_vm13, %v2132_v49 }
 0x39c PF: > { %p14_p9 = scmp.ge.s32.totalorder %s2449_s17, 4   ;;  %s3738_s12 = smov %s2381_s13 }
 0x39d   : > { %s3739_s13 = smov %s2385_s14  ;;  %s3740_s14 = smov %s2459_s20 }
 0x39e   : > { %s3741_s15 = smov %s2449_s17  ;;  %16 = sbr.rel (!%p14_p9) target bundleno = 3 (0x3), region = 80 }
 0x3a3   :  { %2170 = vsyncpa [#allocation4], 1 }
 0x3a4   :  { %2172 = vsyncpa [#allocation4 + $0x1], 1 }

</bundles_post_ra>
